<compile_context>
chip_gen: v7x
topology: tpu7x:2x2x1
jax: 0.10.0
libtpu: 0.0.40
codegen_flags: <defaults>
</compile_context>

<pallas_src>
import functools
import math

import jax
import jax.numpy as jnp
from jax.experimental import pallas as pl
from jax.experimental.pallas import tpu as pltpu

LANE = 128      # lane quantum (last dim)
SUBLANE = 8     # sublane quantum (second-to-last dim)


# ----------------------------------------------------------------------------
# Small helpers
# ----------------------------------------------------------------------------
def _round_up(x, m):
    return ((x + m - 1) // m) * m


def _pad_last(a, n):
    """Zero-pad the last dim of `a` to n (identity if already n)."""
    if a.shape[-1] == n:
        return a
    pad = [(0, 0)] * (a.ndim - 1) + [(0, n - a.shape[-1])]
    return jnp.pad(a, pad)


def _pad_rows(a, rows):
    if a.shape[0] == rows:
        return a
    return jnp.pad(a, ((0, rows - a.shape[0]),) + ((0, 0),) * (a.ndim - 1))


def _choose_block(dim, target, quantum):
    """Return (block, padded_dim).  Full-dim blocks are always legal; otherwise
    pick the largest multiple of `quantum` <= target that divides `dim`; as a
    last resort pad `dim` up to a multiple of `target`."""
    if dim <= target:
        return dim, dim
    blk = (target // quantum) * quantum
    while blk >= quantum:
        if dim % blk == 0:
            return blk, dim
        blk -= quantum
    return target, _round_up(dim, target)


# ----------------------------------------------------------------------------
# Per-generation tiling configuration (feedback: size tiles to the chip)
# ----------------------------------------------------------------------------
def _vmem_capacity_bytes():
    try:
        info = pltpu.get_tpu_info()
        for attr in ("vmem_capacity_bytes", "vmem_bytes", "vmem_size_bytes"):
            v = getattr(info, attr, None)
            if v:
                return int(v)
    except Exception:
        pass
    return 64 * 1024 * 1024            # conservative (v7x-sized) fallback


def _gemm_config():
    cap = _vmem_capacity_bytes()
    if cap >= 96 * 1024 * 1024:        # v5e / v6e: 128 MiB physical VMEM
        return dict(tm=512, tn=512, tk=1024,
                    vmem_limit=min(100 * 1024 * 1024, cap - 16 * 1024 * 1024))
    # v7x: 64 MiB physical VMEM
    return dict(tm=256, tn=256, tk=512, vmem_limit=48 * 1024 * 1024)


_CFG = _gemm_config()
_ATTN_TILE = 256                        # q / kv tile length for flash attention


# ----------------------------------------------------------------------------
# Tiled linear (+bias, optional ReLU):  out = act(x @ W + b)
# Weights arrive pre-padded (lane-dense) from init -> no per-call weight pads.
# ----------------------------------------------------------------------------
def _matmul_kernel(x_ref, w_ref, b_ref, o_ref, acc_ref, *, activation):
    k = pl.program_id(2)

    @pl.when(k == 0)
    def _():
        acc_ref[...] = jnp.zeros_like(acc_ref)

    acc_ref[...] += jnp.dot(x_ref[...], w_ref[...],
                            preferred_element_type=jnp.float32)

    @pl.when(k == pl.num_programs(2) - 1)
    def _():
        out = acc_ref[...] + b_ref[...].astype(jnp.float32)
        if activation == "relu":
            out = jnp.maximum(out, 0.0)
        o_ref[...] = out.astype(o_ref.dtype)


def pallas_linear(x2d, w, b, activation=None):
    """x2d: [M, K], w: [K, N], b: [N] -> [M, N].  Tiled + pipelined."""
    M, K = x2d.shape
    Kw, N = w.shape
    assert K == Kw
    tm, Mp = _choose_block(M, _CFG["tm"], SUBLANE)
    tn, Np = _choose_block(N, _CFG["tn"], LANE)
    tk, Kp = _choose_block(K, _CFG["tk"], LANE)
    assert Np == N and Kp == K, "weights must be pre-padded at init (lane-dense)"

    xp = _pad_rows(x2d, Mp)             # only the (cheap) activation may pad

    # TODO(synk): on v5e, if profiling shows exposed DMA on the K-stream, add
    #             pipeline_mode=pl.Buffered(3) to the weight BlockSpec.
    out = pl.pallas_call(
        functools.partial(_matmul_kernel, activation=activation),
        out_shape=jax.ShapeDtypeStruct((Mp, N), x2d.dtype),
        grid_spec=pltpu.PrefetchScalarGridSpec(
            num_scalar_prefetch=0,
            grid=(Mp // tm, N // tn, K // tk),
            in_specs=[
                pl.BlockSpec((tm, tk), lambda i, j, k: (i, k)),
                pl.BlockSpec((tk, tn), lambda i, j, k: (k, j)),
                pl.BlockSpec((1, tn), lambda i, j, k: (0, j)),
            ],
            out_specs=pl.BlockSpec((tm, tn), lambda i, j, k: (i, j)),
            scratch_shapes=[pltpu.VMEM((tm, tn), jnp.float32)],
        ),
        compiler_params=pltpu.CompilerParams(
            dimension_semantics=("parallel", "parallel", "arbitrary"),
            vmem_limit_bytes=_CFG["vmem_limit"],
        ),
    )(xp, w, b.reshape(1, N))
    return out[:M] if Mp != M else out


# ----------------------------------------------------------------------------
# Tiled linear fused with residual add + LayerNorm epilogue:
#   out = LayerNorm(res + x @ W + b)[:true_n stats] * gamma + beta
# N (padded model dim) is one full block so LN runs in the epilogue; stats use
# the true feature count (pad region of h is exactly zero by construction).
# ----------------------------------------------------------------------------
def _matmul_add_ln_kernel(x_ref, w_ref, b_ref, r_ref, g_ref, be_ref,
                          o_ref, acc_ref, *, eps, true_n):
    k = pl.program_id(1)

    @pl.when(k == 0)
    def _():
        acc_ref[...] = jnp.zeros_like(acc_ref)

    acc_ref[...] += jnp.dot(x_ref[...], w_ref[...],
                            preferred_element_type=jnp.float32)

    @pl.when(k == pl.num_programs(1) - 1)
    def _():
        h = (acc_ref[...] + b_ref[...].astype(jnp.float32)
             + r_ref[...].astype(jnp.float32))
        inv_n = 1.0 / float(true_n)
        mean = jnp.sum(h, axis=-1, keepdims=True) * inv_n
        msq = jnp.sum(h * h, axis=-1, keepdims=True) * inv_n
        var = jnp.maximum(msq - mean * mean, 0.0)
        nrm = (h - mean) * jax.lax.rsqrt(var + eps)
        out = nrm * g_ref[...].astype(jnp.float32) + be_ref[...].astype(jnp.float32)
        o_ref[...] = out.astype(o_ref.dtype)


def pallas_linear_add_ln(x2d, w, b, res2d, gamma, beta, *, true_n, eps=1e-5):
    """x2d: [M, K], w: [K, N], b/gamma/beta: [N], res2d: [M, N] -> [M, N]."""
    M, K = x2d.shape
    Kw, N = w.shape
    assert K == Kw and res2d.shape == (M, N)
    dtb = jnp.dtype(x2d.dtype).itemsize

    # Gate tm/tk so the full-N epilogue fits the per-generation VMEM budget
    # (matters on v7x's 64 MiB at production model dims).
    tm_t, tk_t = _CFG["tm"], _CFG["tk"]
    budget = int(0.7 * _CFG["vmem_limit"])

    def footprint(tm, tk):
        return (2 * tm * tk * dtb         # x blocks (double buffered)
                + 2 * tk * N * dtb        # w blocks
                + 2 * tm * N * dtb        # residual blocks
                + 2 * tm * N * dtb        # output blocks
                + tm * N * 4              # f32 accumulator
                + 6 * N * dtb)            # bias / gamma / beta
    while footprint(min(tm_t, M), min(tk_t, K)) > budget and tk_t > 256:
        tk_t //= 2
    while footprint(min(tm_t, M), min(tk_t, K)) > budget and tm_t > 64:
        tm_t //= 2
    # TODO(synk): for very large model dims on v7x, tile N and use a two-pass
    #             LayerNorm instead of shrinking tm/tk.

    tm, Mp = _choose_block(M, tm_t, SUBLANE)
    tk, Kp = _choose_block(K, tk_t, LANE)
    assert Kp == K, "weights must be pre-padded at init (lane-dense)"

    xp = _pad_rows(x2d, Mp)
    rp = _pad_rows(res2d, Mp)

    out = pl.pallas_call(
        functools.partial(_matmul_add_ln_kernel, eps=eps, true_n=true_n),
        out_shape=jax.ShapeDtypeStruct((Mp, N), x2d.dtype),
        grid_spec=pltpu.PrefetchScalarGridSpec(
            num_scalar_prefetch=0,
            grid=(Mp // tm, K // tk),
            in_specs=[
                pl.BlockSpec((tm, tk), lambda i, k: (i, k)),
                pl.BlockSpec((tk, N), lambda i, k: (k, 0)),
                pl.BlockSpec((1, N), lambda i, k: (0, 0)),
                pl.BlockSpec((tm, N), lambda i, k: (i, 0)),
                pl.BlockSpec((1, N), lambda i, k: (0, 0)),
                pl.BlockSpec((1, N), lambda i, k: (0, 0)),
            ],
            out_specs=pl.BlockSpec((tm, N), lambda i, k: (i, 0)),
            scratch_shapes=[pltpu.VMEM((tm, N), jnp.float32)],
        ),
        compiler_params=pltpu.CompilerParams(
            dimension_semantics=("parallel", "arbitrary"),
            vmem_limit_bytes=_CFG["vmem_limit"],
        ),
    )(xp, w, b.reshape(1, N), rp, gamma.reshape(1, N), beta.reshape(1, N))
    return out[:M] if Mp != M else out


# ----------------------------------------------------------------------------
# Flash-style multi-head attention.
# Layout: q/k/v are [B, H, T, Dh] (every block starts at lane 0).
# Grid: (B, H, q_tiles, kv_tiles); B/H/q "parallel" (v7x 2-core balance),
# kv axis "arbitrary" with online-softmax accumulators in VMEM scratch.
# The 1/sqrt(Dh) scale is already folded into the Q projection weights.
# ----------------------------------------------------------------------------
def _flash_attn_kernel(q_ref, k_ref, v_ref, o_ref, m_sc, l_sc, acc_sc,
                       *, causal, tq, tkv):
    qi = pl.program_id(2)
    ki = pl.program_id(3)

    @pl.when(ki == 0)
    def _():
        m_sc[...] = jnp.full_like(m_sc, -1e30)
        l_sc[...] = jnp.zeros_like(l_sc)
        acc_sc[...] = jnp.zeros_like(acc_sc)

    def compute():
        q = q_ref[0, 0]                               # [tq, Dh]
        k = k_ref[0, 0]                               # [tkv, Dh]
        v = v_ref[0, 0]
        s = jax.lax.dot_general(q, k, (((1,), (1,)), ((), ())),
                                preferred_element_type=jnp.float32)  # [tq, tkv]
        if causal:
            row = qi * tq + jax.lax.broadcasted_iota(jnp.int32, (tq, tkv), 0)
            col = ki * tkv + jax.lax.broadcasted_iota(jnp.int32, (tq, tkv), 1)
            keep = row >= col
            s = jnp.where(keep, s, -1e30)
        m_prev = m_sc[...]
        m_new = jnp.maximum(m_prev, jnp.max(s, axis=-1, keepdims=True))
        alpha = jnp.exp(m_prev - m_new)
        p = jnp.exp(s - m_new)
        if causal:
            p = jnp.where(keep, p, 0.0)
        l_sc[...] = alpha * l_sc[...] + jnp.sum(p, axis=-1, keepdims=True)
        acc_sc[...] = alpha * acc_sc[...] + jax.lax.dot_general(
            p.astype(v.dtype), v, (((1,), (0,)), ((), ())),
            preferred_element_type=jnp.float32)
        m_sc[...] = m_new

    if causal:
        # Skip KV tiles that are entirely above the causal diagonal.
        @pl.when(qi * tq + (tq - 1) >= ki * tkv)
        def _():
            compute()
    else:
        compute()

    @pl.when(ki == pl.num_programs(3) - 1)
    def _():
        inv = pl.reciprocal(l_sc[...], approx=True)   # EUP slot
        o_ref[0, 0] = (acc_sc[...] * inv).astype(o_ref.dtype)


def pallas_flash_attention(q, k, v, *, causal):
    """q: [B, H, Tq, Dh], k/v: [B, H, Tk, Dh] -> [B, H, Tq, Dh]."""
    B, H, Tq, Dh = q.shape
    Tk = k.shape[2]
    tq = Tq if Tq <= _ATTN_TILE else _ATTN_TILE
    tkv = Tk if Tk <= _ATTN_TILE else _ATTN_TILE
    # TODO(synk): pad + in-kernel length-mask for ragged sequence lengths.
    assert Tq % tq == 0 and Tk % tkv == 0, "seq len must divide the attn tile"

    kernel = functools.partial(_flash_attn_kernel, causal=causal, tq=tq, tkv=tkv)
    return pl.pallas_call(
        kernel,
        out_shape=jax.ShapeDtypeStruct((B, H, Tq, Dh), q.dtype),
        grid_spec=pltpu.PrefetchScalarGridSpec(
            num_scalar_prefetch=0,
            grid=(B, H, Tq // tq, Tk // tkv),
            in_specs=[
                pl.BlockSpec((1, 1, tq, Dh), lambda b, h, i, j: (b, h, i, 0)),
                pl.BlockSpec((1, 1, tkv, Dh), lambda b, h, i, j: (b, h, j, 0)),
                pl.BlockSpec((1, 1, tkv, Dh), lambda b, h, i, j: (b, h, j, 0)),
            ],
            out_specs=pl.BlockSpec((1, 1, tq, Dh), lambda b, h, i, j: (b, h, i, 0)),
            scratch_shapes=[pltpu.VMEM((tq, 1), jnp.float32),
                            pltpu.VMEM((tq, 1), jnp.float32),
                            pltpu.VMEM((tq, Dh), jnp.float32)],
        ),
        compiler_params=pltpu.CompilerParams(
            dimension_semantics=("parallel", "parallel", "parallel", "arbitrary"),
            vmem_limit_bytes=_CFG["vmem_limit"],
        ),
    )(q, k, v)


# ----------------------------------------------------------------------------
# Model glue (plain JAX: embedding lookup, positional encoding, head reshapes)
# ----------------------------------------------------------------------------
def positional_encoding(seq_len, n_dim):
    pos = jnp.arange(seq_len, dtype=jnp.float32)[:, None]
    i = jnp.arange(n_dim, dtype=jnp.float32)[None, :]
    angle = pos / jnp.power(10000.0, (2.0 * jnp.floor(i / 2.0)) / n_dim)
    return jnp.where((jnp.arange(n_dim) % 2) == 0, jnp.sin(angle), jnp.cos(angle))


def _split_heads(x3d, off, D, H, Dh):
    """[B, T, Np] -> take true cols [off:off+D] -> [B, H, T, Dh] (layout plumbing)."""
    B, T, _ = x3d.shape
    return x3d[:, :, off:off + D].reshape(B, T, H, Dh).transpose(0, 2, 1, 3)


def _merge_heads(x4d, Dp):
    """[B, H, T, Dh] -> [B*T, Dp] (re-padded; identity pad at production dims)."""
    B, H, T, Dh = x4d.shape
    x2d = x4d.transpose(0, 2, 1, 3).reshape(B * T, H * Dh)
    return _pad_last(x2d, Dp)


def decoder_layer(p, x, enc_p, *, n_head, n_dim):
    B, T, Dp = x.shape
    D, H = n_dim, n_head
    Dh = D // H
    Tk = enc_p.shape[1]
    x2d = x.reshape(B * T, Dp)

    # masked self-attention: fused QKV GEMM -> flash attention -> fused
    # o-proj + residual + LayerNorm.
    sa = p["self_attn"]
    qkv = pallas_linear(x2d, sa["wqkv"], sa["bqkv"]).reshape(B, T, 3 * Dp)
    q = _split_heads(qkv, 0, D, H, Dh)
    k = _split_heads(qkv, Dp, D, H, Dh)
    v = _split_heads(qkv, 2 * Dp, D, H, Dh)
    attn = pallas_flash_attention(q, k, v, causal=True)        # [B, H, T, Dh]
    # TODO(synk): fuse the o-projection into the attention epilogue to remove
    #             one [B,T,D] HBM round trip per layer.
    h2d = pallas_linear_add_ln(_merge_heads(attn, Dp), sa["wo"], sa["bo"],
                               x2d, p["ln_g"], p["ln_b"], true_n=D)

    # transformer block: cross-attention -> Add&LN -> FFN(ReLU) -> Add&LN
    tb = p["tb"]
    ca = tb["attn"]
    qc = pallas_linear(h2d, ca["wq"], ca["bq"]).reshape(B, T, Dp)
    kvc = pallas_linear(enc_p.reshape(B * Tk, Dp), ca["wkv"], ca["bkv"]
                        ).reshape(B, Tk, 2 * Dp)
    qh = _split_heads(qc, 0, D, H, Dh)
    kh = _split_heads(kvc, 0, D, H, Dh)
    vh = _split_heads(kvc, Dp, D, H, Dh)
    cattn = pallas_flash_attention(qh, kh, vh, causal=False)
    h22d = pallas_linear_add_ln(_merge_heads(cattn, Dp), ca["wo"], ca["bo"],
                                h2d, tb["ln1_g"], tb["ln1_b"], true_n=D)

    ff = pallas_linear(h22d, tb["w1"], tb["b1"], activation="relu")
    out2d = pallas_linear_add_ln(ff, tb["w2"], tb["b2"], h22d,
                                 tb["ln2_g"], tb["ln2_b"], true_n=D)
    return out2d.reshape(B, T, Dp)


def decoder_block_forward(params, output_encoder, input_decoder, mask,
                          *, n_head, n_dim, vocab_size):
    # `mask` is accepted for interface parity with the PyTorch module; the
    # decoder self-attention mask is the standard causal (tril) mask, which the
    # attention kernel generates in-kernel via iota (no [Tq, Tk] mask DMA).
    # TODO(synk): plumb arbitrary (e.g. padding) masks into the kernel if needed.
    del mask
    dtype = params["fc_w"].dtype
    Dp = params["embedding"].shape[1]
    B, T = input_decoder.shape

    emb = jnp.take(params["embedding"], input_decoder, axis=0)      # [B, T, Dp]
    pe = _pad_last(positional_encoding(T, n_dim), Dp)               # [T, Dp]
    x = (emb.astype(jnp.float32) + pe[None]).astype(dtype)

    enc_p = _pad_last(output_encoder.astype(dtype), Dp)             # [B, Tk, Dp]

    out = x
    for layer_p in params["layers"]:
        out = decoder_layer(layer_p, out, enc_p, n_head=n_head, n_dim=n_dim)
        # Dropout(0.1) in eval mode == identity

    logits = pallas_linear(out.reshape(B * T, Dp), params["fc_w"], params["fc_b"])
    return logits[:, :vocab_size].reshape(B, T, vocab_size)


# ----------------------------------------------------------------------------
# Deterministic parameter initialization (pre-padded, lane-dense, optional
# scale folding for Q projections).
# ----------------------------------------------------------------------------
def _init_linear(key, fan_in, fan_out, pad_in, pad_out, dtype, scale=1.0):
    kw, kb = jax.random.split(key)
    w = jax.random.normal(kw, (fan_in, fan_out), jnp.float32) / math.sqrt(fan_in)
    b = 0.01 * jax.random.normal(kb, (fan_out,), jnp.float32)
    w, b = w * scale, b * scale
    wp = jnp.zeros((pad_in, pad_out), jnp.float32).at[:fan_in, :fan_out].set(w)
    bp = jnp.zeros((pad_out,), jnp.float32).at[:fan_out].set(b)
    return wp.astype(dtype), bp.astype(dtype)


def _init_self_mha(key, n_dim, Dp, q_scale, dtype):
    ks = jax.random.split(key, 4)
    wq, bq = _init_linear(ks[0], n_dim, n_dim, Dp, Dp, dtype, scale=q_scale)
    wk, bk = _init_linear(ks[1], n_dim, n_dim, Dp, Dp, dtype)
    wv, bv = _init_linear(ks[2], n_dim, n_dim, Dp, Dp, dtype)
    wo, bo = _init_linear(ks[3], n_dim, n_dim, Dp, Dp, dtype)
    return dict(wqkv=jnp.concatenate([wq, wk, wv], axis=1),
                bqkv=jnp.concatenate([bq, bk, bv], axis=0),
                wo=wo, bo=bo)


def _init_cross_mha(key, n_dim, Dp, q_scale, dtype):
    ks = jax.random.split(key, 4)
    wq, bq = _init_linear(ks[0], n_dim, n_dim, Dp, Dp, dtype, scale=q_scale)
    wk, bk = _init_linear(ks[1], n_dim, n_dim, Dp, Dp, dtype)
    wv, bv = _init_linear(ks[2], n_dim, n_dim, Dp, Dp, dtype)
    wo, bo = _init_linear(ks[3], n_dim, n_dim, Dp, Dp, dtype)
    return dict(wq=wq, bq=bq,
                wkv=jnp.concatenate([wk, wv], axis=1),
                bkv=jnp.concatenate([bk, bv], axis=0),
                wo=wo, bo=bo)


def _init_ln(n_dim, Dp, dtype):
    g = jnp.zeros((Dp,), jnp.float32).at[:n_dim].set(1.0).astype(dtype)
    b = jnp.zeros((Dp,), dtype)
    return g, b


def init_decoder_block(key, n_head, n_dim, vocab_size, n_expansion, n_layer,
                       dtype=jnp.bfloat16):
    Dp = _round_up(n_dim, LANE)
    hidden = n_expansion * n_dim
    Fp = _round_up(hidden, LANE)
    Vp = _round_up(vocab_size, LANE)
    q_scale = 1.0 / math.sqrt(n_dim // n_head)   # folded 1/sqrt(Dh)

    keys = jax.random.split(key, 2 + n_layer)
    emb = jax.random.normal(keys[0], (vocab_size, n_dim), jnp.float32) * 0.02
    embedding = jnp.zeros((vocab_size, Dp), jnp.float32).at[:, :n_dim].set(emb)
    fc_w, fc_b = _init_linear(keys[1], n_dim, vocab_size, Dp, Vp, dtype)

    layers = []
    for li in range(n_layer):
        lk = jax.random.split(keys[2 + li], 4)
        w1, b1 = _init_linear(lk[2], n_dim, hidden, Dp, Fp, dtype)
        w2, b2 = _init_linear(lk[3], hidden, n_dim, Fp, Dp, dtype)
        ln_g, ln_b = _init_ln(n_dim, Dp, dtype)
        ln1_g, ln1_b = _init_ln(n_dim, Dp, dtype)
        ln2_g, ln2_b = _init_ln(n_dim, Dp, dtype)
        layers.append(dict(
            self_attn=_init_self_mha(lk[0], n_dim, Dp, q_scale, dtype),
            ln_g=ln_g, ln_b=ln_b,
            tb=dict(
                attn=_init_cross_mha(lk[1], n_dim, Dp, q_scale, dtype),
                ln1_g=ln1_g, ln1_b=ln1_b,
                w1=w1, b1=b1, w2=w2, b2=b2,
                ln2_g=ln2_g, ln2_b=ln2_b,
            ),
        ))
    return dict(embedding=embedding.astype(dtype), layers=layers,
                fc_w=fc_w, fc_b=fc_b)


# ----------------------------------------------------------------------------
if __name__ == "__main__":
    n_head, n_dim, seq_length, vocab_size, n_expansion, n_layer = 4, 32, 8, 16, 4, 2
    batch = 2
    dtype = jnp.bfloat16   # MXU-native; f32 accumulators / softmax / LN stats in-kernel

    key = jax.random.PRNGKey(0)
    k_par, k_enc, k_tok = jax.random.split(key, 3)

    params = init_decoder_block(k_par, n_head, n_dim, vocab_size, n_expansion,
                                n_layer, dtype=dtype)

    output_encoder = jax.random.normal(
        k_enc, (batch, seq_length, n_dim), jnp.float32).astype(dtype)
    input_decoder = jax.random.randint(k_tok, (batch, seq_length), 0, vocab_size)
    # causal mask (interface parity with the PyTorch module; generated in-kernel)
    mask = jnp.tril(jnp.ones((seq_length, seq_length), jnp.float32))

    fwd = jax.jit(functools.partial(decoder_block_forward, n_head=n_head,
                                    n_dim=n_dim, vocab_size=vocab_size))
    logits = fwd(params, output_encoder, input_decoder, mask)
    jax.block_until_ready(logits)

    assert logits.shape == (batch, seq_length, vocab_size)
    assert bool(jnp.all(jnp.isfinite(logits.astype(jnp.float32))))
    print("KERNEL_OK")
</pallas_src>

<mosaic_0001>
module attributes {stable_mosaic.version = 11 : i64} {
  func.func @_matmul_kernel(%arg0: i32, %arg1: i32, %arg2: i32, %arg3: memref<16x128xbf16, #tpu.memory_space<vmem>>, %arg4: memref<128x128xbf16, #tpu.memory_space<vmem>>, %arg5: memref<1x128xbf16, #tpu.memory_space<vmem>>, %arg6: memref<16x128xbf16, #tpu.memory_space<vmem>>, %arg7: memref<16x128xf32, #tpu.memory_space<vmem>>) attributes {dimension_semantics = [#tpu.dimension_semantics<parallel>, #tpu.dimension_semantics<parallel>, #tpu.dimension_semantics<arbitrary>], iteration_bounds = array<i64: 1, 3, 1>, scalar_prefetch = 0 : i64, scratch_operands = 1 : i64, tpu.core_type = #tpu.core_type<tc>, window_params = [{transform_indices = @transform_0, window_bounds = array<i64: 16, 128>}, {transform_indices = @transform_1, window_bounds = array<i64: 128, 128>}, {transform_indices = @transform_2, window_bounds = array<i64: 1, 128>}, {transform_indices = @transform_3, window_bounds = array<i64: 16, 128>}]} {
    %c0_i32 = arith.constant 0 : i32
    %0 = arith.cmpi eq, %arg2, %c0_i32 : i32
    %1 = arith.extui %0 : i1 to i32
    %c0_i32_0 = arith.constant 0 : i32
    %2 = arith.cmpi ne, %1, %c0_i32_0 : i32
    scf.if %2 {
      %cst_10 = arith.constant 0.000000e+00 : f32
      %12 = vector.broadcast %cst_10 : f32 to vector<16x128xf32>
      %c0_11 = arith.constant 0 : index
      %c0_12 = arith.constant 0 : index
      %13 = vector.load %arg7[%c0_11, %c0_12] : memref<16x128xf32, #tpu.memory_space<vmem>>, vector<16x128xf32>
      tpu.vector_store %arg7[%c0_11, %c0_12], %12 {strides = array<i32>} : memref<16x128xf32, #tpu.memory_space<vmem>>, vector<16x128xf32>,
    } else {
    }
    %c0 = arith.constant 0 : index
    %c0_1 = arith.constant 0 : index
    %3 = vector.load %arg7[%c0, %c0_1] : memref<16x128xf32, #tpu.memory_space<vmem>>, vector<16x128xf32>
    %c0_2 = arith.constant 0 : index
    %c0_3 = arith.constant 0 : index
    %4 = vector.load %arg3[%c0_2, %c0_3] : memref<16x128xbf16, #tpu.memory_space<vmem>>, vector<16x128xbf16>
    %c0_4 = arith.constant 0 : index
    %c0_5 = arith.constant 0 : index
    %5 = vector.load %arg4[%c0_4, %c0_5] : memref<128x128xbf16, #tpu.memory_space<vmem>>, vector<128x128xbf16>
    %cst = arith.constant dense<0.000000e+00> : vector<16x128xf32>
    %6 = tpu.matmul %4, %5, %cst {dimension_numbers = #tpu.dot_dimension_numbers<[1], [0], [0], [1], [0, 0, 1, 1], [], []>} : vector<16x128xbf16>, vector<128x128xbf16>, vector<16x128xf32> -> vector<16x128xf32>
    %7 = arith.addf %3, %6 : vector<16x128xf32>
    %c0_6 = arith.constant 0 : index
    %c0_7 = arith.constant 0 : index
    %8 = vector.load %arg7[%c0_6, %c0_7] : memref<16x128xf32, #tpu.memory_space<vmem>>, vector<16x128xf32>
    tpu.vector_store %arg7[%c0_6, %c0_7], %7 {strides = array<i32>} : memref<16x128xf32, #tpu.memory_space<vmem>>, vector<16x128xf32>,
    %c0_i32_8 = arith.constant 0 : i32
    %9 = arith.cmpi eq, %arg2, %c0_i32_8 : i32
    %10 = arith.extui %9 : i1 to i32
    %c0_i32_9 = arith.constant 0 : i32
    %11 = arith.cmpi ne, %10, %c0_i32_9 : i32
    scf.if %11 {
      %c0_10 = arith.constant 0 : index
      %c0_11 = arith.constant 0 : index
      %12 = vector.load %arg7[%c0_10, %c0_11] : memref<16x128xf32, #tpu.memory_space<vmem>>, vector<16x128xf32>
      %c0_12 = arith.constant 0 : index
      %c0_13 = arith.constant 0 : index
      %13 = vector.load %arg5[%c0_12, %c0_13] : memref<1x128xbf16, #tpu.memory_space<vmem>>, vector<1x128xbf16>
      %14 = arith.extf %13 : vector<1x128xbf16> to vector<1x128xf32>
      %15 = vector.broadcast %14 : vector<1x128xf32> to vector<16x128xf32>
      %16 = arith.addf %12, %15 : vector<16x128xf32>
      %17 = arith.truncf %16 : vector<16x128xf32> to vector<16x128xbf16>
      %c0_14 = arith.constant 0 : index
      %c0_15 = arith.constant 0 : index
      %18 = vector.load %arg6[%c0_14, %c0_15] : memref<16x128xbf16, #tpu.memory_space<vmem>>, vector<16x128xbf16>
      tpu.vector_store %arg6[%c0_14, %c0_15], %17 {strides = array<i32>} : memref<16x128xbf16, #tpu.memory_space<vmem>>, vector<16x128xbf16>,
    } else {
    }
    return
  }
  func.func @transform_0(%arg0: i32, %arg1: i32, %arg2: i32) -> (i32, i32) {
    %c0_i32 = arith.constant 0 : i32
    return %arg0, %arg2 : i32, i32
  }
  func.func @transform_1(%arg0: i32, %arg1: i32, %arg2: i32) -> (i32, i32) {
    %c0_i32 = arith.constant 0 : i32
    return %arg2, %arg1 : i32, i32
  }
  func.func @transform_2(%arg0: i32, %arg1: i32, %arg2: i32) -> (i32, i32) {
    %c0_i32 = arith.constant 0 : i32
    %c0_i32_0 = arith.constant 0 : i32
    return %c0_i32, %arg1 : i32, i32
  }
  func.func @transform_3(%arg0: i32, %arg1: i32, %arg2: i32) -> (i32, i32) {
    %c0_i32 = arith.constant 0 : i32
    return %arg0, %arg1 : i32, i32
  }
}

module attributes {stable_mosaic.version = 11 : i64} {
  func.func @_flash_attn_kernel(%arg0: i32, %arg1: i32, %arg2: i32, %arg3: i32, %arg4: memref<1x1x8x8xbf16, #tpu.memory_space<vmem>>, %arg5: memref<1x1x8x8xbf16, #tpu.memory_space<vmem>>, %arg6: memref<1x1x8x8xbf16, #tpu.memory_space<vmem>>, %arg7: memref<1x1x8x8xbf16, #tpu.memory_space<vmem>>, %arg8: memref<8x1xf32, #tpu.memory_space<vmem>>, %arg9: memref<8x1xf32, #tpu.memory_space<vmem>>, %arg10: memref<8x8xf32, #tpu.memory_space<vmem>>) attributes {dimension_semantics = [#tpu.dimension_semantics<parallel>, #tpu.dimension_semantics<parallel>, #tpu.dimension_semantics<parallel>, #tpu.dimension_semantics<arbitrary>], iteration_bounds = array<i64: 2, 4, 1, 1>, scalar_prefetch = 0 : i64, scratch_operands = 3 : i64, tpu.core_type = #tpu.core_type<tc>, window_params = [{transform_indices = @transform_0, window_bounds = array<i64: 1, 1, 8, 8>}, {transform_indices = @transform_1, window_bounds = array<i64: 1, 1, 8, 8>}, {transform_indices = @transform_2, window_bounds = array<i64: 1, 1, 8, 8>}, {transform_indices = @transform_3, window_bounds = array<i64: 1, 1, 8, 8>}]} {
    %c0_i32 = arith.constant 0 : i32
    %0 = arith.cmpi eq, %arg3, %c0_i32 : i32
    %1 = arith.extui %0 : i1 to i32
    %c0_i32_0 = arith.constant 0 : i32
    %2 = arith.cmpi ne, %1, %c0_i32_0 : i32
    scf.if %2 {
      %cst = arith.constant -1.000000e+30 : f32
      %12 = vector.broadcast %cst : f32 to vector<8x1xf32>
      %c0 = arith.constant 0 : index
      %c0_5 = arith.constant 0 : index
      %13 = vector.load %arg8[%c0, %c0_5] : memref<8x1xf32, #tpu.memory_space<vmem>>, vector<8x1xf32>
      tpu.vector_store %arg8[%c0, %c0_5], %12 {strides = array<i32>} : memref<8x1xf32, #tpu.memory_space<vmem>>, vector<8x1xf32>,
      %cst_6 = arith.constant 0.000000e+00 : f32
      %14 = vector.broadcast %cst_6 : f32 to vector<8x1xf32>
      %c0_7 = arith.constant 0 : index
      %c0_8 = arith.constant 0 : index
      %15 = vector.load %arg9[%c0_7, %c0_8] : memref<8x1xf32, #tpu.memory_space<vmem>>, vector<8x1xf32>
      tpu.vector_store %arg9[%c0_7, %c0_8], %14 {strides = array<i32>} : memref<8x1xf32, #tpu.memory_space<vmem>>, vector<8x1xf32>,
      %cst_9 = arith.constant 0.000000e+00 : f32
      %16 = vector.broadcast %cst_9 : f32 to vector<8x8xf32>
      %c0_10 = arith.constant 0 : index
      %c0_11 = arith.constant 0 : index
      %17 = vector.load %arg10[%c0_10, %c0_11] : memref<8x8xf32, #tpu.memory_space<vmem>>, vector<8x8xf32>
      tpu.vector_store %arg10[%c0_10, %c0_11], %16 {strides = array<i32>} : memref<8x8xf32, #tpu.memory_space<vmem>>, vector<8x8xf32>,
    } else {
    }
    %c8_i32 = arith.constant 8 : i32
    %3 = arith.muli %arg2, %c8_i32 : i32
    %c7_i32 = arith.constant 7 : i32
    %4 = arith.addi %3, %c7_i32 : i32
    %c8_i32_1 = arith.constant 8 : i32
    %5 = arith.muli %arg3, %c8_i32_1 : i32
    %6 = arith.cmpi sge, %4, %5 : i32
    %7 = arith.extui %6 : i1 to i32
    %c0_i32_2 = arith.constant 0 : i32
    %8 = arith.cmpi ne, %7, %c0_i32_2 : i32
    scf.if %8 {
      %c0 = arith.constant 0 : index
      %c0_5 = arith.constant 0 : index
      %c0_6 = arith.constant 0 : index
      %c0_7 = arith.constant 0 : index
      %12 = vector.load %arg4[%c0, %c0_5, %c0_6, %c0_7] : memref<1x1x8x8xbf16, #tpu.memory_space<vmem>>, vector<1x1x8x8xbf16>
      %13 = vector.shape_cast %12 : vector<1x1x8x8xbf16> to vector<8x8xbf16>
      %c0_8 = arith.constant 0 : index
      %c0_9 = arith.constant 0 : index
      %c0_10 = arith.constant 0 : index
      %c0_11 = arith.constant 0 : index
      %14 = vector.load %arg5[%c0_8, %c0_9, %c0_10, %c0_11] : memref<1x1x8x8xbf16, #tpu.memory_space<vmem>>, vector<1x1x8x8xbf16>
      %15 = vector.shape_cast %14 : vector<1x1x8x8xbf16> to vector<8x8xbf16>
      %c0_12 = arith.constant 0 : index
      %c0_13 = arith.constant 0 : index
      %c0_14 = arith.constant 0 : index
      %c0_15 = arith.constant 0 : index
      %16 = vector.load %arg6[%c0_12, %c0_13, %c0_14, %c0_15] : memref<1x1x8x8xbf16, #tpu.memory_space<vmem>>, vector<1x1x8x8xbf16>
      %17 = vector.shape_cast %16 : vector<1x1x8x8xbf16> to vector<8x8xbf16>
      %cst = arith.constant dense<0.000000e+00> : vector<8x8xf32>
      %18 = tpu.matmul %13, %15, %cst {dimension_numbers = #tpu.dot_dimension_numbers<[1], [1], [0], [0], [0, 0, 1, 0], [], []>} : vector<8x8xbf16>, vector<8x8xbf16>, vector<8x8xf32> -> vector<8x8xf32>
      %c8_i32_16 = arith.constant 8 : i32
      %19 = arith.muli %arg2, %c8_i32_16 : i32
      %20 = tpu.iota {dimensions = array<i32: 0>} : vector<8x8xi32>
      %21 = vector.broadcast %19 : i32 to vector<8x8xi32>
      %22 = arith.addi %21, %20 : vector<8x8xi32>
      %c8_i32_17 = arith.constant 8 : i32
      %23 = arith.muli %arg3, %c8_i32_17 : i32
      %24 = tpu.iota {dimensions = array<i32: 1>} : vector<8x8xi32>
      %25 = vector.broadcast %23 : i32 to vector<8x8xi32>
      %26 = arith.addi %25, %24 : vector<8x8xi32>
      %27 = arith.cmpi sge, %22, %26 : vector<8x8xi32>
      %cst_18 = arith.constant -1.000000e+30 : f32
      %28 = vector.broadcast %cst_18 : f32 to vector<8x8xf32>
      %29 = arith.select %27, %18, %28 : vector<8x8xi1>, vector<8x8xf32>
      %c0_19 = arith.constant 0 : index
      %c0_20 = arith.constant 0 : index
      %30 = vector.load %arg8[%c0_19, %c0_20] : memref<8x1xf32, #tpu.memory_space<vmem>>, vector<8x1xf32>
      %cst_21 = arith.constant dense<0xFF800000> : vector<8xf32>
      %31 = vector.multi_reduction <maximumf>, %29, %cst_21 [1] : vector<8x8xf32> to vector<8xf32>
      %32 = vector.shape_cast %31 : vector<8xf32> to vector<8x1xf32>
      %33 = arith.maximumf %30, %32 : vector<8x1xf32>
      %34 = arith.subf %30, %33 : vector<8x1xf32>
      %35 = math.exp %34 : vector<8x1xf32>
      %36 = vector.broadcast %33 : vector<8x1xf32> to vector<8x8xf32>
      %37 = arith.subf %29, %36 : vector<8x8xf32>
      %38 = math.exp %37 : vector<8x8xf32>
      %cst_22 = arith.constant 0.000000e+00 : f32
      %39 = vector.broadcast %cst_22 : f32 to vector<8x8xf32>
      %40 = arith.select %27, %38, %39 : vector<8x8xi1>, vector<8x8xf32>
      %c0_23 = arith.constant 0 : index
      %c0_24 = arith.constant 0 : index
      %41 = vector.load %arg9[%c0_23, %c0_24] : memref<8x1xf32, #tpu.memory_space<vmem>>, vector<8x1xf32>
      %42 = arith.mulf %35, %41 : vector<8x1xf32>
      %cst_25 = arith.constant dense<0.000000e+00> : vector<8xf32>
      %43 = vector.multi_reduction <add>, %40, %cst_25 [1] : vector<8x8xf32> to vector<8xf32>
      %44 = vector.shape_cast %43 : vector<8xf32> to vector<8x1xf32>
      %45 = arith.addf %42, %44 : vector<8x1xf32>
      %c0_26 = arith.constant 0 : index
      %c0_27 = arith.constant 0 : index
      %46 = vector.load %arg9[%c0_26, %c0_27] : memref<8x1xf32, #tpu.memory_space<vmem>>, vector<8x1xf32>
      tpu.vector_store %arg9[%c0_26, %c0_27], %45 {strides = array<i32>} : memref<8x1xf32, #tpu.memory_space<vmem>>, vector<8x1xf32>,
      %c0_28 = arith.constant 0 : index
      %c0_29 = arith.constant 0 : index
      %47 = vector.load %arg10[%c0_28, %c0_29] : memref<8x8xf32, #tpu.memory_space<vmem>>, vector<8x8xf32>
      %48 = vector.broadcast %35 : vector<8x1xf32> to vector<8x8xf32>
      %49 = arith.mulf %48, %47 : vector<8x8xf32>
      %50 = arith.truncf %40 : vector<8x8xf32> to vector<8x8xbf16>
      %cst_30 = arith.constant dense<0.000000e+00> : vector<8x8xf32>
      %51 = tpu.matmul %50, %17, %cst_30 {dimension_numbers = #tpu.dot_dimension_numbers<[1], [0], [0], [1], [0, 0, 1, 1], [], []>} : vector<8x8xbf16>, vector<8x8xbf16>, vector<8x8xf32> -> vector<8x8xf32>
      %52 = arith.addf %49, %51 : vector<8x8xf32>
      %c0_31 = arith.constant 0 : index
      %c0_32 = arith.constant 0 : index
      %53 = vector.load %arg10[%c0_31, %c0_32] : memref<8x8xf32, #tpu.memory_space<vmem>>, vector<8x8xf32>
      tpu.vector_store %arg10[%c0_31, %c0_32], %52 {strides = array<i32>} : memref<8x8xf32, #tpu.memory_space<vmem>>, vector<8x8xf32>,
      %c0_33 = arith.constant 0 : index
      %c0_34 = arith.constant 0 : index
      %54 = vector.load %arg8[%c0_33, %c0_34] : memref<8x1xf32, #tpu.memory_space<vmem>>, vector<8x1xf32>
      tpu.vector_store %arg8[%c0_33, %c0_34], %33 {strides = array<i32>} : memref<8x1xf32, #tpu.memory_space<vmem>>, vector<8x1xf32>,
    } else {
    }
    %c0_i32_3 = arith.constant 0 : i32
    %9 = arith.cmpi eq, %arg3, %c0_i32_3 : i32
    %10 = arith.extui %9 : i1 to i32
    %c0_i32_4 = arith.constant 0 : i32
    %11 = arith.cmpi ne, %10, %c0_i32_4 : i32
    scf.if %11 {
      %c0 = arith.constant 0 : index
      %c0_5 = arith.constant 0 : index
      %12 = vector.load %arg9[%c0, %c0_5] : memref<8x1xf32, #tpu.memory_space<vmem>>, vector<8x1xf32>
      %13 = tpu.reciprocal %12 {approx = true} : vector<8x1xf32> -> vector<8x1xf32>
      %c0_6 = arith.constant 0 : index
      %c0_7 = arith.constant 0 : index
      %14 = vector.load %arg10[%c0_6, %c0_7] : memref<8x8xf32, #tpu.memory_space<vmem>>, vector<8x8xf32>
      %15 = vector.broadcast %13 : vector<8x1xf32> to vector<8x8xf32>
      %16 = arith.mulf %14, %15 : vector<8x8xf32>
      %17 = arith.truncf %16 : vector<8x8xf32> to vector<8x8xbf16>
      %c0_8 = arith.constant 0 : index
      %c0_9 = arith.constant 0 : index
      %c0_10 = arith.constant 0 : index
      %c0_11 = arith.constant 0 : index
      %18 = vector.load %arg7[%c0_8, %c0_9, %c0_10, %c0_11] : memref<1x1x8x8xbf16, #tpu.memory_space<vmem>>, vector<1x1x8x8xbf16>
      %19 = vector.shape_cast %18 : vector<1x1x8x8xbf16> to vector<8x8xbf16>
      %20 = vector.shape_cast %17 : vector<8x8xbf16> to vector<1x1x8x8xbf16>
      tpu.vector_store %arg7[%c0_8, %c0_9, %c0_10, %c0_11], %20 {strides = array<i32>} : memref<1x1x8x8xbf16, #tpu.memory_space<vmem>>, vector<1x1x8x8xbf16>,
    } else {
    }
    return
  }
  func.func @transform_0(%arg0: i32, %arg1: i32, %arg2: i32, %arg3: i32) -> (i32, i32, i32, i32) {
    %c0_i32 = arith.constant 0 : i32
    %c0_i32_0 = arith.constant 0 : i32
    return %arg0, %arg1, %arg2, %c0_i32 : i32, i32, i32, i32
  }
  func.func @transform_1(%arg0: i32, %arg1: i32, %arg2: i32, %arg3: i32) -> (i32, i32, i32, i32) {
    %c0_i32 = arith.constant 0 : i32
    %c0_i32_0 = arith.constant 0 : i32
    return %arg0, %arg1, %arg3, %c0_i32 : i32, i32, i32, i32
  }
  func.func @transform_2(%arg0: i32, %arg1: i32, %arg2: i32, %arg3: i32) -> (i32, i32, i32, i32) {
    %c0_i32 = arith.constant 0 : i32
    %c0_i32_0 = arith.constant 0 : i32
    return %arg0, %arg1, %arg3, %c0_i32 : i32, i32, i32, i32
  }
  func.func @transform_3(%arg0: i32, %arg1: i32, %arg2: i32, %arg3: i32) -> (i32, i32, i32, i32) {
    %c0_i32 = arith.constant 0 : i32
    %c0_i32_0 = arith.constant 0 : i32
    return %arg0, %arg1, %arg2, %c0_i32 : i32, i32, i32, i32
  }
}

module attributes {stable_mosaic.version = 11 : i64} {
  func.func @_matmul_add_ln_kernel(%arg0: i32, %arg1: i32, %arg2: memref<16x128xbf16, #tpu.memory_space<vmem>>, %arg3: memref<128x128xbf16, #tpu.memory_space<vmem>>, %arg4: memref<1x128xbf16, #tpu.memory_space<vmem>>, %arg5: memref<16x128xbf16, #tpu.memory_space<vmem>>, %arg6: memref<1x128xbf16, #tpu.memory_space<vmem>>, %arg7: memref<1x128xbf16, #tpu.memory_space<vmem>>, %arg8: memref<16x128xbf16, #tpu.memory_space<vmem>>, %arg9: memref<16x128xf32, #tpu.memory_space<vmem>>) attributes {dimension_semantics = [#tpu.dimension_semantics<parallel>, #tpu.dimension_semantics<arbitrary>], iteration_bounds = array<i64: 1, 1>, scalar_prefetch = 0 : i64, scratch_operands = 1 : i64, tpu.core_type = #tpu.core_type<tc>, window_params = [{transform_indices = @transform_0, window_bounds = array<i64: 16, 128>}, {transform_indices = @transform_1, window_bounds = array<i64: 128, 128>}, {pipeline_mode = #tpu.pipeline_mode<synchronous>, transform_indices = @transform_2, window_bounds = array<i64: 1, 128>}, {transform_indices = @transform_3, window_bounds = array<i64: 16, 128>}, {pipeline_mode = #tpu.pipeline_mode<synchronous>, transform_indices = @transform_4, window_bounds = array<i64: 1, 128>}, {pipeline_mode = #tpu.pipeline_mode<synchronous>, transform_indices = @transform_5, window_bounds = array<i64: 1, 128>}, {transform_indices = @transform_6, window_bounds = array<i64: 16, 128>}]} {
    %c0_i32 = arith.constant 0 : i32
    %0 = arith.cmpi eq, %arg1, %c0_i32 : i32
    %1 = arith.extui %0 : i1 to i32
    %c0_i32_0 = arith.constant 0 : i32
    %2 = arith.cmpi ne, %1, %c0_i32_0 : i32
    scf.if %2 {
      %cst_10 = arith.constant 0.000000e+00 : f32
      %12 = vector.broadcast %cst_10 : f32 to vector<16x128xf32>
      %c0_11 = arith.constant 0 : index
      %c0_12 = arith.constant 0 : index
      %13 = vector.load %arg9[%c0_11, %c0_12] : memref<16x128xf32, #tpu.memory_space<vmem>>, vector<16x128xf32>
      tpu.vector_store %arg9[%c0_11, %c0_12], %12 {strides = array<i32>} : memref<16x128xf32, #tpu.memory_space<vmem>>, vector<16x128xf32>,
    } else {
    }
    %c0 = arith.constant 0 : index
    %c0_1 = arith.constant 0 : index
    %3 = vector.load %arg9[%c0, %c0_1] : memref<16x128xf32, #tpu.memory_space<vmem>>, vector<16x128xf32>
    %c0_2 = arith.constant 0 : index
    %c0_3 = arith.constant 0 : index
    %4 = vector.load %arg2[%c0_2, %c0_3] : memref<16x128xbf16, #tpu.memory_space<vmem>>, vector<16x128xbf16>
    %c0_4 = arith.constant 0 : index
    %c0_5 = arith.constant 0 : index
    %5 = vector.load %arg3[%c0_4, %c0_5] : memref<128x128xbf16, #tpu.memory_space<vmem>>, vector<128x128xbf16>
    %cst = arith.constant dense<0.000000e+00> : vector<16x128xf32>
    %6 = tpu.matmul %4, %5, %cst {dimension_numbers = #tpu.dot_dimension_numbers<[1], [0], [0], [1], [0, 0, 1, 1], [], []>} : vector<16x128xbf16>, vector<128x128xbf16>, vector<16x128xf32> -> vector<16x128xf32>
    %7 = arith.addf %3, %6 : vector<16x128xf32>
    %c0_6 = arith.constant 0 : index
    %c0_7 = arith.constant 0 : index
    %8 = vector.load %arg9[%c0_6, %c0_7] : memref<16x128xf32, #tpu.memory_space<vmem>>, vector<16x128xf32>
    tpu.vector_store %arg9[%c0_6, %c0_7], %7 {strides = array<i32>} : memref<16x128xf32, #tpu.memory_space<vmem>>, vector<16x128xf32>,
    %c0_i32_8 = arith.constant 0 : i32
    %9 = arith.cmpi eq, %arg1, %c0_i32_8 : i32
    %10 = arith.extui %9 : i1 to i32
    %c0_i32_9 = arith.constant 0 : i32
    %11 = arith.cmpi ne, %10, %c0_i32_9 : i32
    scf.if %11 {
      %c0_10 = arith.constant 0 : index
      %c0_11 = arith.constant 0 : index
      %12 = vector.load %arg9[%c0_10, %c0_11] : memref<16x128xf32, #tpu.memory_space<vmem>>, vector<16x128xf32>
      %c0_12 = arith.constant 0 : index
      %c0_13 = arith.constant 0 : index
      %13 = vector.load %arg4[%c0_12, %c0_13] : memref<1x128xbf16, #tpu.memory_space<vmem>>, vector<1x128xbf16>
      %14 = arith.extf %13 : vector<1x128xbf16> to vector<1x128xf32>
      %15 = vector.broadcast %14 : vector<1x128xf32> to vector<16x128xf32>
      %16 = arith.addf %12, %15 : vector<16x128xf32>
      %c0_14 = arith.constant 0 : index
      %c0_15 = arith.constant 0 : index
      %17 = vector.load %arg5[%c0_14, %c0_15] : memref<16x128xbf16, #tpu.memory_space<vmem>>, vector<16x128xbf16>
      %18 = arith.extf %17 : vector<16x128xbf16> to vector<16x128xf32>
      %19 = arith.addf %16, %18 : vector<16x128xf32>
      %cst_16 = arith.constant dense<0.000000e+00> : vector<16xf32>
      %20 = vector.multi_reduction <add>, %19, %cst_16 [1] : vector<16x128xf32> to vector<16xf32>
      %21 = vector.shape_cast %20 : vector<16xf32> to vector<16x1xf32>
      %cst_17 = arith.constant 3.125000e-02 : f32
      %22 = vector.broadcast %cst_17 : f32 to vector<16x1xf32>
      %23 = arith.mulf %21, %22 : vector<16x1xf32>
      %24 = arith.mulf %19, %19 : vector<16x128xf32>
      %cst_18 = arith.constant dense<0.000000e+00> : vector<16xf32>
      %25 = vector.multi_reduction <add>, %24, %cst_18 [1] : vector<16x128xf32> to vector<16xf32>
      %26 = vector.shape_cast %25 : vector<16xf32> to vector<16x1xf32>
      %cst_19 = arith.constant 3.125000e-02 : f32
      %27 = vector.broadcast %cst_19 : f32 to vector<16x1xf32>
      %28 = arith.mulf %26, %27 : vector<16x1xf32>
      %29 = arith.mulf %23, %23 : vector<16x1xf32>
      %30 = arith.subf %28, %29 : vector<16x1xf32>
      %cst_20 = arith.constant 0.000000e+00 : f32
      %31 = vector.broadcast %cst_20 : f32 to vector<16x1xf32>
      %32 = arith.maximumf %30, %31 : vector<16x1xf32>
      %33 = vector.broadcast %23 : vector<16x1xf32> to vector<16x128xf32>
      %34 = arith.subf %19, %33 : vector<16x128xf32>
      %cst_21 = arith.constant 9.99999974E-6 : f32
      %35 = vector.broadcast %cst_21 : f32 to vector<16x1xf32>
      %36 = arith.addf %32, %35 : vector<16x1xf32>
      %37 = math.rsqrt %36 : vector<16x1xf32>
      %38 = vector.broadcast %37 : vector<16x1xf32> to vector<16x128xf32>
      %39 = arith.mulf %34, %38 : vector<16x128xf32>
      %c0_22 = arith.constant 0 : index
      %c0_23 = arith.constant 0 : index
      %40 = vector.load %arg6[%c0_22, %c0_23] : memref<1x128xbf16, #tpu.memory_space<vmem>>, vector<1x128xbf16>
      %41 = arith.extf %40 : vector<1x128xbf16> to vector<1x128xf32>
      %42 = vector.broadcast %41 : vector<1x128xf32> to vector<16x128xf32>
      %43 = arith.mulf %39, %42 : vector<16x128xf32>
      %c0_24 = arith.constant 0 : index
      %c0_25 = arith.constant 0 : index
      %44 = vector.load %arg7[%c0_24, %c0_25] : memref<1x128xbf16, #tpu.memory_space<vmem>>, vector<1x128xbf16>
      %45 = arith.extf %44 : vector<1x128xbf16> to vector<1x128xf32>
      %46 = vector.broadcast %45 : vector<1x128xf32> to vector<16x128xf32>
      %47 = arith.addf %43, %46 : vector<16x128xf32>
      %48 = arith.truncf %47 : vector<16x128xf32> to vector<16x128xbf16>
      %c0_26 = arith.constant 0 : index
      %c0_27 = arith.constant 0 : index
      %49 = vector.load %arg8[%c0_26, %c0_27] : memref<16x128xbf16, #tpu.memory_space<vmem>>, vector<16x128xbf16>
      tpu.vector_store %arg8[%c0_26, %c0_27], %48 {strides = array<i32>} : memref<16x128xbf16, #tpu.memory_space<vmem>>, vector<16x128xbf16>,
    } else {
    }
    return
  }
  func.func @transform_0(%arg0: i32, %arg1: i32) -> (i32, i32) {
    %c0_i32 = arith.constant 0 : i32
    return %arg0, %arg1 : i32, i32
  }
  func.func @transform_1(%arg0: i32, %arg1: i32) -> (i32, i32) {
    %c0_i32 = arith.constant 0 : i32
    %c0_i32_0 = arith.constant 0 : i32
    return %arg1, %c0_i32 : i32, i32
  }
  func.func @transform_2(%arg0: i32, %arg1: i32) -> (i32, i32) {
    %c0_i32 = arith.constant 0 : i32
    %c0_i32_0 = arith.constant 0 : i32
    %c0_i32_1 = arith.constant 0 : i32
    return %c0_i32, %c0_i32_0 : i32, i32
  }
  func.func @transform_3(%arg0: i32, %arg1: i32) -> (i32, i32) {
    %c0_i32 = arith.constant 0 : i32
    %c0_i32_0 = arith.constant 0 : i32
    return %arg0, %c0_i32 : i32, i32
  }
  func.func @transform_4(%arg0: i32, %arg1: i32) -> (i32, i32) {
    %c0_i32 = arith.constant 0 : i32
    %c0_i32_0 = arith.constant 0 : i32
    %c0_i32_1 = arith.constant 0 : i32
    return %c0_i32, %c0_i32_0 : i32, i32
  }
  func.func @transform_5(%arg0: i32, %arg1: i32) -> (i32, i32) {
    %c0_i32 = arith.constant 0 : i32
    %c0_i32_0 = arith.constant 0 : i32
    %c0_i32_1 = arith.constant 0 : i32
    return %c0_i32, %c0_i32_0 : i32, i32
  }
  func.func @transform_6(%arg0: i32, %arg1: i32) -> (i32, i32) {
    %c0_i32 = arith.constant 0 : i32
    %c0_i32_0 = arith.constant 0 : i32
    return %arg0, %c0_i32 : i32, i32
  }
}

module attributes {stable_mosaic.version = 11 : i64} {
  func.func @_matmul_kernel(%arg0: i32, %arg1: i32, %arg2: i32, %arg3: memref<16x128xbf16, #tpu.memory_space<vmem>>, %arg4: memref<128x128xbf16, #tpu.memory_space<vmem>>, %arg5: memref<1x128xbf16, #tpu.memory_space<vmem>>, %arg6: memref<16x128xbf16, #tpu.memory_space<vmem>>, %arg7: memref<16x128xf32, #tpu.memory_space<vmem>>) attributes {dimension_semantics = [#tpu.dimension_semantics<parallel>, #tpu.dimension_semantics<parallel>, #tpu.dimension_semantics<arbitrary>], iteration_bounds = array<i64: 1, 1, 1>, scalar_prefetch = 0 : i64, scratch_operands = 1 : i64, tpu.core_type = #tpu.core_type<tc>, window_params = [{transform_indices = @transform_0, window_bounds = array<i64: 16, 128>}, {transform_indices = @transform_1, window_bounds = array<i64: 128, 128>}, {transform_indices = @transform_2, window_bounds = array<i64: 1, 128>}, {transform_indices = @transform_3, window_bounds = array<i64: 16, 128>}]} {
    %c0_i32 = arith.constant 0 : i32
    %0 = arith.cmpi eq, %arg2, %c0_i32 : i32
    %1 = arith.extui %0 : i1 to i32
    %c0_i32_0 = arith.constant 0 : i32
    %2 = arith.cmpi ne, %1, %c0_i32_0 : i32
    scf.if %2 {
      %cst_10 = arith.constant 0.000000e+00 : f32
      %12 = vector.broadcast %cst_10 : f32 to vector<16x128xf32>
      %c0_11 = arith.constant 0 : index
      %c0_12 = arith.constant 0 : index
      %13 = vector.load %arg7[%c0_11, %c0_12] : memref<16x128xf32, #tpu.memory_space<vmem>>, vector<16x128xf32>
      tpu.vector_store %arg7[%c0_11, %c0_12], %12 {strides = array<i32>} : memref<16x128xf32, #tpu.memory_space<vmem>>, vector<16x128xf32>,
    } else {
    }
    %c0 = arith.constant 0 : index
    %c0_1 = arith.constant 0 : index
    %3 = vector.load %arg7[%c0, %c0_1] : memref<16x128xf32, #tpu.memory_space<vmem>>, vector<16x128xf32>
    %c0_2 = arith.constant 0 : index
    %c0_3 = arith.constant 0 : index
    %4 = vector.load %arg3[%c0_2, %c0_3] : memref<16x128xbf16, #tpu.memory_space<vmem>>, vector<16x128xbf16>
    %c0_4 = arith.constant 0 : index
    %c0_5 = arith.constant 0 : index
    %5 = vector.load %arg4[%c0_4, %c0_5] : memref<128x128xbf16, #tpu.memory_space<vmem>>, vector<128x128xbf16>
    %cst = arith.constant dense<0.000000e+00> : vector<16x128xf32>
    %6 = tpu.matmul %4, %5, %cst {dimension_numbers = #tpu.dot_dimension_numbers<[1], [0], [0], [1], [0, 0, 1, 1], [], []>} : vector<16x128xbf16>, vector<128x128xbf16>, vector<16x128xf32> -> vector<16x128xf32>
    %7 = arith.addf %3, %6 : vector<16x128xf32>
    %c0_6 = arith.constant 0 : index
    %c0_7 = arith.constant 0 : index
    %8 = vector.load %arg7[%c0_6, %c0_7] : memref<16x128xf32, #tpu.memory_space<vmem>>, vector<16x128xf32>
    tpu.vector_store %arg7[%c0_6, %c0_7], %7 {strides = array<i32>} : memref<16x128xf32, #tpu.memory_space<vmem>>, vector<16x128xf32>,
    %c0_i32_8 = arith.constant 0 : i32
    %9 = arith.cmpi eq, %arg2, %c0_i32_8 : i32
    %10 = arith.extui %9 : i1 to i32
    %c0_i32_9 = arith.constant 0 : i32
    %11 = arith.cmpi ne, %10, %c0_i32_9 : i32
    scf.if %11 {
      %c0_10 = arith.constant 0 : index
      %c0_11 = arith.constant 0 : index
      %12 = vector.load %arg7[%c0_10, %c0_11] : memref<16x128xf32, #tpu.memory_space<vmem>>, vector<16x128xf32>
      %c0_12 = arith.constant 0 : index
      %c0_13 = arith.constant 0 : index
      %13 = vector.load %arg5[%c0_12, %c0_13] : memref<1x128xbf16, #tpu.memory_space<vmem>>, vector<1x128xbf16>
      %14 = arith.extf %13 : vector<1x128xbf16> to vector<1x128xf32>
      %15 = vector.broadcast %14 : vector<1x128xf32> to vector<16x128xf32>
      %16 = arith.addf %12, %15 : vector<16x128xf32>
      %17 = arith.truncf %16 : vector<16x128xf32> to vector<16x128xbf16>
      %c0_14 = arith.constant 0 : index
      %c0_15 = arith.constant 0 : index
      %18 = vector.load %arg6[%c0_14, %c0_15] : memref<16x128xbf16, #tpu.memory_space<vmem>>, vector<16x128xbf16>
      tpu.vector_store %arg6[%c0_14, %c0_15], %17 {strides = array<i32>} : memref<16x128xbf16, #tpu.memory_space<vmem>>, vector<16x128xbf16>,
    } else {
    }
    return
  }
  func.func @transform_0(%arg0: i32, %arg1: i32, %arg2: i32) -> (i32, i32) {
    %c0_i32 = arith.constant 0 : i32
    return %arg0, %arg2 : i32, i32
  }
  func.func @transform_1(%arg0: i32, %arg1: i32, %arg2: i32) -> (i32, i32) {
    %c0_i32 = arith.constant 0 : i32
    return %arg2, %arg1 : i32, i32
  }
  func.func @transform_2(%arg0: i32, %arg1: i32, %arg2: i32) -> (i32, i32) {
    %c0_i32 = arith.constant 0 : i32
    %c0_i32_0 = arith.constant 0 : i32
    return %c0_i32, %arg1 : i32, i32
  }
  func.func @transform_3(%arg0: i32, %arg1: i32, %arg2: i32) -> (i32, i32) {
    %c0_i32 = arith.constant 0 : i32
    return %arg0, %arg1 : i32, i32
  }
}

module attributes {stable_mosaic.version = 11 : i64} {
  func.func @_matmul_kernel(%arg0: i32, %arg1: i32, %arg2: i32, %arg3: memref<16x128xbf16, #tpu.memory_space<vmem>>, %arg4: memref<128x256xbf16, #tpu.memory_space<vmem>>, %arg5: memref<1x256xbf16, #tpu.memory_space<vmem>>, %arg6: memref<16x256xbf16, #tpu.memory_space<vmem>>, %arg7: memref<16x256xf32, #tpu.memory_space<vmem>>) attributes {dimension_semantics = [#tpu.dimension_semantics<parallel>, #tpu.dimension_semantics<parallel>, #tpu.dimension_semantics<arbitrary>], iteration_bounds = array<i64: 1, 1, 1>, scalar_prefetch = 0 : i64, scratch_operands = 1 : i64, tpu.core_type = #tpu.core_type<tc>, window_params = [{transform_indices = @transform_0, window_bounds = array<i64: 16, 128>}, {transform_indices = @transform_1, window_bounds = array<i64: 128, 256>}, {transform_indices = @transform_2, window_bounds = array<i64: 1, 256>}, {transform_indices = @transform_3, window_bounds = array<i64: 16, 256>}]} {
    %c0_i32 = arith.constant 0 : i32
    %0 = arith.cmpi eq, %arg2, %c0_i32 : i32
    %1 = arith.extui %0 : i1 to i32
    %c0_i32_0 = arith.constant 0 : i32
    %2 = arith.cmpi ne, %1, %c0_i32_0 : i32
    scf.if %2 {
      %cst_10 = arith.constant 0.000000e+00 : f32
      %12 = vector.broadcast %cst_10 : f32 to vector<16x256xf32>
      %c0_11 = arith.constant 0 : index
      %c0_12 = arith.constant 0 : index
      %13 = vector.load %arg7[%c0_11, %c0_12] : memref<16x256xf32, #tpu.memory_space<vmem>>, vector<16x256xf32>
      tpu.vector_store %arg7[%c0_11, %c0_12], %12 {strides = array<i32>} : memref<16x256xf32, #tpu.memory_space<vmem>>, vector<16x256xf32>,
    } else {
    }
    %c0 = arith.constant 0 : index
    %c0_1 = arith.constant 0 : index
    %3 = vector.load %arg7[%c0, %c0_1] : memref<16x256xf32, #tpu.memory_space<vmem>>, vector<16x256xf32>
    %c0_2 = arith.constant 0 : index
    %c0_3 = arith.constant 0 : index
    %4 = vector.load %arg3[%c0_2, %c0_3] : memref<16x128xbf16, #tpu.memory_space<vmem>>, vector<16x128xbf16>
    %c0_4 = arith.constant 0 : index
    %c0_5 = arith.constant 0 : index
    %5 = vector.load %arg4[%c0_4, %c0_5] : memref<128x256xbf16, #tpu.memory_space<vmem>>, vector<128x256xbf16>
    %cst = arith.constant dense<0.000000e+00> : vector<16x256xf32>
    %6 = tpu.matmul %4, %5, %cst {dimension_numbers = #tpu.dot_dimension_numbers<[1], [0], [0], [1], [0, 0, 1, 1], [], []>} : vector<16x128xbf16>, vector<128x256xbf16>, vector<16x256xf32> -> vector<16x256xf32>
    %7 = arith.addf %3, %6 : vector<16x256xf32>
    %c0_6 = arith.constant 0 : index
    %c0_7 = arith.constant 0 : index
    %8 = vector.load %arg7[%c0_6, %c0_7] : memref<16x256xf32, #tpu.memory_space<vmem>>, vector<16x256xf32>
    tpu.vector_store %arg7[%c0_6, %c0_7], %7 {strides = array<i32>} : memref<16x256xf32, #tpu.memory_space<vmem>>, vector<16x256xf32>,
    %c0_i32_8 = arith.constant 0 : i32
    %9 = arith.cmpi eq, %arg2, %c0_i32_8 : i32
    %10 = arith.extui %9 : i1 to i32
    %c0_i32_9 = arith.constant 0 : i32
    %11 = arith.cmpi ne, %10, %c0_i32_9 : i32
    scf.if %11 {
      %c0_10 = arith.constant 0 : index
      %c0_11 = arith.constant 0 : index
      %12 = vector.load %arg7[%c0_10, %c0_11] : memref<16x256xf32, #tpu.memory_space<vmem>>, vector<16x256xf32>
      %c0_12 = arith.constant 0 : index
      %c0_13 = arith.constant 0 : index
      %13 = vector.load %arg5[%c0_12, %c0_13] : memref<1x256xbf16, #tpu.memory_space<vmem>>, vector<1x256xbf16>
      %14 = arith.extf %13 : vector<1x256xbf16> to vector<1x256xf32>
      %15 = vector.broadcast %14 : vector<1x256xf32> to vector<16x256xf32>
      %16 = arith.addf %12, %15 : vector<16x256xf32>
      %17 = arith.truncf %16 : vector<16x256xf32> to vector<16x256xbf16>
      %c0_14 = arith.constant 0 : index
      %c0_15 = arith.constant 0 : index
      %18 = vector.load %arg6[%c0_14, %c0_15] : memref<16x256xbf16, #tpu.memory_space<vmem>>, vector<16x256xbf16>
      tpu.vector_store %arg6[%c0_14, %c0_15], %17 {strides = array<i32>} : memref<16x256xbf16, #tpu.memory_space<vmem>>, vector<16x256xbf16>,
    } else {
    }
    return
  }
  func.func @transform_0(%arg0: i32, %arg1: i32, %arg2: i32) -> (i32, i32) {
    %c0_i32 = arith.constant 0 : i32
    return %arg0, %arg2 : i32, i32
  }
  func.func @transform_1(%arg0: i32, %arg1: i32, %arg2: i32) -> (i32, i32) {
    %c0_i32 = arith.constant 0 : i32
    return %arg2, %arg1 : i32, i32
  }
  func.func @transform_2(%arg0: i32, %arg1: i32, %arg2: i32) -> (i32, i32) {
    %c0_i32 = arith.constant 0 : i32
    %c0_i32_0 = arith.constant 0 : i32
    return %c0_i32, %arg1 : i32, i32
  }
  func.func @transform_3(%arg0: i32, %arg1: i32, %arg2: i32) -> (i32, i32) {
    %c0_i32 = arith.constant 0 : i32
    return %arg0, %arg1 : i32, i32
  }
}

module attributes {stable_mosaic.version = 11 : i64} {
  func.func @_flash_attn_kernel(%arg0: i32, %arg1: i32, %arg2: i32, %arg3: i32, %arg4: memref<1x1x8x8xbf16, #tpu.memory_space<vmem>>, %arg5: memref<1x1x8x8xbf16, #tpu.memory_space<vmem>>, %arg6: memref<1x1x8x8xbf16, #tpu.memory_space<vmem>>, %arg7: memref<1x1x8x8xbf16, #tpu.memory_space<vmem>>, %arg8: memref<8x1xf32, #tpu.memory_space<vmem>>, %arg9: memref<8x1xf32, #tpu.memory_space<vmem>>, %arg10: memref<8x8xf32, #tpu.memory_space<vmem>>) attributes {dimension_semantics = [#tpu.dimension_semantics<parallel>, #tpu.dimension_semantics<parallel>, #tpu.dimension_semantics<parallel>, #tpu.dimension_semantics<arbitrary>], iteration_bounds = array<i64: 2, 4, 1, 1>, scalar_prefetch = 0 : i64, scratch_operands = 3 : i64, tpu.core_type = #tpu.core_type<tc>, window_params = [{transform_indices = @transform_0, window_bounds = array<i64: 1, 1, 8, 8>}, {transform_indices = @transform_1, window_bounds = array<i64: 1, 1, 8, 8>}, {transform_indices = @transform_2, window_bounds = array<i64: 1, 1, 8, 8>}, {transform_indices = @transform_3, window_bounds = array<i64: 1, 1, 8, 8>}]} {
    %c0_i32 = arith.constant 0 : i32
    %0 = arith.cmpi eq, %arg3, %c0_i32 : i32
    %1 = arith.extui %0 : i1 to i32
    %c0_i32_0 = arith.constant 0 : i32
    %2 = arith.cmpi ne, %1, %c0_i32_0 : i32
    scf.if %2 {
      %cst_29 = arith.constant -1.000000e+30 : f32
      %36 = vector.broadcast %cst_29 : f32 to vector<8x1xf32>
      %c0_30 = arith.constant 0 : index
      %c0_31 = arith.constant 0 : index
      %37 = vector.load %arg8[%c0_30, %c0_31] : memref<8x1xf32, #tpu.memory_space<vmem>>, vector<8x1xf32>
      tpu.vector_store %arg8[%c0_30, %c0_31], %36 {strides = array<i32>} : memref<8x1xf32, #tpu.memory_space<vmem>>, vector<8x1xf32>,
      %cst_32 = arith.constant 0.000000e+00 : f32
      %38 = vector.broadcast %cst_32 : f32 to vector<8x1xf32>
      %c0_33 = arith.constant 0 : index
      %c0_34 = arith.constant 0 : index
      %39 = vector.load %arg9[%c0_33, %c0_34] : memref<8x1xf32, #tpu.memory_space<vmem>>, vector<8x1xf32>
      tpu.vector_store %arg9[%c0_33, %c0_34], %38 {strides = array<i32>} : memref<8x1xf32, #tpu.memory_space<vmem>>, vector<8x1xf32>,
      %cst_35 = arith.constant 0.000000e+00 : f32
      %40 = vector.broadcast %cst_35 : f32 to vector<8x8xf32>
      %c0_36 = arith.constant 0 : index
      %c0_37 = arith.constant 0 : index
      %41 = vector.load %arg10[%c0_36, %c0_37] : memref<8x8xf32, #tpu.memory_space<vmem>>, vector<8x8xf32>
      tpu.vector_store %arg10[%c0_36, %c0_37], %40 {strides = array<i32>} : memref<8x8xf32, #tpu.memory_space<vmem>>, vector<8x8xf32>,
    } else {
    }
    %c0 = arith.constant 0 : index
    %c0_1 = arith.constant 0 : index
    %c0_2 = arith.constant 0 : index
    %c0_3 = arith.constant 0 : index
    %3 = vector.load %arg4[%c0, %c0_1, %c0_2, %c0_3] : memref<1x1x8x8xbf16, #tpu.memory_space<vmem>>, vector<1x1x8x8xbf16>
    %4 = vector.shape_cast %3 : vector<1x1x8x8xbf16> to vector<8x8xbf16>
    %c0_4 = arith.constant 0 : index
    %c0_5 = arith.constant 0 : index
    %c0_6 = arith.constant 0 : index
    %c0_7 = arith.constant 0 : index
    %5 = vector.load %arg5[%c0_4, %c0_5, %c0_6, %c0_7] : memref<1x1x8x8xbf16, #tpu.memory_space<vmem>>, vector<1x1x8x8xbf16>
    %6 = vector.shape_cast %5 : vector<1x1x8x8xbf16> to vector<8x8xbf16>
    %c0_8 = arith.constant 0 : index
    %c0_9 = arith.constant 0 : index
    %c0_10 = arith.constant 0 : index
    %c0_11 = arith.constant 0 : index
    %7 = vector.load %arg6[%c0_8, %c0_9, %c0_10, %c0_11] : memref<1x1x8x8xbf16, #tpu.memory_space<vmem>>, vector<1x1x8x8xbf16>
    %8 = vector.shape_cast %7 : vector<1x1x8x8xbf16> to vector<8x8xbf16>
    %cst = arith.constant dense<0.000000e+00> : vector<8x8xf32>
    %9 = tpu.matmul %4, %6, %cst {dimension_numbers = #tpu.dot_dimension_numbers<[1], [1], [0], [0], [0, 0, 1, 0], [], []>} : vector<8x8xbf16>, vector<8x8xbf16>, vector<8x8xf32> -> vector<8x8xf32>
    %c0_12 = arith.constant 0 : index
    %c0_13 = arith.constant 0 : index
    %10 = vector.load %arg8[%c0_12, %c0_13] : memref<8x1xf32, #tpu.memory_space<vmem>>, vector<8x1xf32>
    %cst_14 = arith.constant dense<0xFF800000> : vector<8xf32>
    %11 = vector.multi_reduction <maximumf>, %9, %cst_14 [1] : vector<8x8xf32> to vector<8xf32>
    %12 = vector.shape_cast %11 : vector<8xf32> to vector<8x1xf32>
    %13 = arith.maximumf %10, %12 : vector<8x1xf32>
    %14 = arith.subf %10, %13 : vector<8x1xf32>
    %15 = math.exp %14 : vector<8x1xf32>
    %16 = vector.broadcast %13 : vector<8x1xf32> to vector<8x8xf32>
    %17 = arith.subf %9, %16 : vector<8x8xf32>
    %18 = math.exp %17 : vector<8x8xf32>
    %c0_15 = arith.constant 0 : index
    %c0_16 = arith.constant 0 : index
    %19 = vector.load %arg9[%c0_15, %c0_16] : memref<8x1xf32, #tpu.memory_space<vmem>>, vector<8x1xf32>
    %20 = arith.mulf %15, %19 : vector<8x1xf32>
    %cst_17 = arith.constant dense<0.000000e+00> : vector<8xf32>
    %21 = vector.multi_reduction <add>, %18, %cst_17 [1] : vector<8x8xf32> to vector<8xf32>
    %22 = vector.shape_cast %21 : vector<8xf32> to vector<8x1xf32>
    %23 = arith.addf %20, %22 : vector<8x1xf32>
    %c0_18 = arith.constant 0 : index
    %c0_19 = arith.constant 0 : index
    %24 = vector.load %arg9[%c0_18, %c0_19] : memref<8x1xf32, #tpu.memory_space<vmem>>, vector<8x1xf32>
    tpu.vector_store %arg9[%c0_18, %c0_19], %23 {strides = array<i32>} : memref<8x1xf32, #tpu.memory_space<vmem>>, vector<8x1xf32>,
    %c0_20 = arith.constant 0 : index
    %c0_21 = arith.constant 0 : index
    %25 = vector.load %arg10[%c0_20, %c0_21] : memref<8x8xf32, #tpu.memory_space<vmem>>, vector<8x8xf32>
    %26 = vector.broadcast %15 : vector<8x1xf32> to vector<8x8xf32>
    %27 = arith.mulf %26, %25 : vector<8x8xf32>
    %28 = arith.truncf %18 : vector<8x8xf32> to vector<8x8xbf16>
    %cst_22 = arith.constant dense<0.000000e+00> : vector<8x8xf32>
    %29 = tpu.matmul %28, %8, %cst_22 {dimension_numbers = #tpu.dot_dimension_numbers<[1], [0], [0], [1], [0, 0, 1, 1], [], []>} : vector<8x8xbf16>, vector<8x8xbf16>, vector<8x8xf32> -> vector<8x8xf32>
    %30 = arith.addf %27, %29 : vector<8x8xf32>
    %c0_23 = arith.constant 0 : index
    %c0_24 = arith.constant 0 : index
    %31 = vector.load %arg10[%c0_23, %c0_24] : memref<8x8xf32, #tpu.memory_space<vmem>>, vector<8x8xf32>
    tpu.vector_store %arg10[%c0_23, %c0_24], %30 {strides = array<i32>} : memref<8x8xf32, #tpu.memory_space<vmem>>, vector<8x8xf32>,
    %c0_25 = arith.constant 0 : index
    %c0_26 = arith.constant 0 : index
    %32 = vector.load %arg8[%c0_25, %c0_26] : memref<8x1xf32, #tpu.memory_space<vmem>>, vector<8x1xf32>
    tpu.vector_store %arg8[%c0_25, %c0_26], %13 {strides = array<i32>} : memref<8x1xf32, #tpu.memory_space<vmem>>, vector<8x1xf32>,
    %c0_i32_27 = arith.constant 0 : i32
    %33 = arith.cmpi eq, %arg3, %c0_i32_27 : i32
    %34 = arith.extui %33 : i1 to i32
    %c0_i32_28 = arith.constant 0 : i32
    %35 = arith.cmpi ne, %34, %c0_i32_28 : i32
    scf.if %35 {
      %c0_29 = arith.constant 0 : index
      %c0_30 = arith.constant 0 : index
      %36 = vector.load %arg9[%c0_29, %c0_30] : memref<8x1xf32, #tpu.memory_space<vmem>>, vector<8x1xf32>
      %37 = tpu.reciprocal %36 {approx = true} : vector<8x1xf32> -> vector<8x1xf32>
      %c0_31 = arith.constant 0 : index
      %c0_32 = arith.constant 0 : index
      %38 = vector.load %arg10[%c0_31, %c0_32] : memref<8x8xf32, #tpu.memory_space<vmem>>, vector<8x8xf32>
      %39 = vector.broadcast %37 : vector<8x1xf32> to vector<8x8xf32>
      %40 = arith.mulf %38, %39 : vector<8x8xf32>
      %41 = arith.truncf %40 : vector<8x8xf32> to vector<8x8xbf16>
      %c0_33 = arith.constant 0 : index
      %c0_34 = arith.constant 0 : index
      %c0_35 = arith.constant 0 : index
      %c0_36 = arith.constant 0 : index
      %42 = vector.load %arg7[%c0_33, %c0_34, %c0_35, %c0_36] : memref<1x1x8x8xbf16, #tpu.memory_space<vmem>>, vector<1x1x8x8xbf16>
      %43 = vector.shape_cast %42 : vector<1x1x8x8xbf16> to vector<8x8xbf16>
      %44 = vector.shape_cast %41 : vector<8x8xbf16> to vector<1x1x8x8xbf16>
      tpu.vector_store %arg7[%c0_33, %c0_34, %c0_35, %c0_36], %44 {strides = array<i32>} : memref<1x1x8x8xbf16, #tpu.memory_space<vmem>>, vector<1x1x8x8xbf16>,
    } else {
    }
    return
  }
  func.func @transform_0(%arg0: i32, %arg1: i32, %arg2: i32, %arg3: i32) -> (i32, i32, i32, i32) {
    %c0_i32 = arith.constant 0 : i32
    %c0_i32_0 = arith.constant 0 : i32
    return %arg0, %arg1, %arg2, %c0_i32 : i32, i32, i32, i32
  }
  func.func @transform_1(%arg0: i32, %arg1: i32, %arg2: i32, %arg3: i32) -> (i32, i32, i32, i32) {
    %c0_i32 = arith.constant 0 : i32
    %c0_i32_0 = arith.constant 0 : i32
    return %arg0, %arg1, %arg3, %c0_i32 : i32, i32, i32, i32
  }
  func.func @transform_2(%arg0: i32, %arg1: i32, %arg2: i32, %arg3: i32) -> (i32, i32, i32, i32) {
    %c0_i32 = arith.constant 0 : i32
    %c0_i32_0 = arith.constant 0 : i32
    return %arg0, %arg1, %arg3, %c0_i32 : i32, i32, i32, i32
  }
  func.func @transform_3(%arg0: i32, %arg1: i32, %arg2: i32, %arg3: i32) -> (i32, i32, i32, i32) {
    %c0_i32 = arith.constant 0 : i32
    %c0_i32_0 = arith.constant 0 : i32
    return %arg0, %arg1, %arg2, %c0_i32 : i32, i32, i32, i32
  }
}

module attributes {stable_mosaic.version = 11 : i64} {
  func.func @_matmul_kernel(%arg0: i32, %arg1: i32, %arg2: i32, %arg3: memref<16x128xbf16, #tpu.memory_space<vmem>>, %arg4: memref<128x128xbf16, #tpu.memory_space<vmem>>, %arg5: memref<1x128xbf16, #tpu.memory_space<vmem>>, %arg6: memref<16x128xbf16, #tpu.memory_space<vmem>>, %arg7: memref<16x128xf32, #tpu.memory_space<vmem>>) attributes {dimension_semantics = [#tpu.dimension_semantics<parallel>, #tpu.dimension_semantics<parallel>, #tpu.dimension_semantics<arbitrary>], iteration_bounds = array<i64: 1, 1, 1>, scalar_prefetch = 0 : i64, scratch_operands = 1 : i64, tpu.core_type = #tpu.core_type<tc>, window_params = [{transform_indices = @transform_0, window_bounds = array<i64: 16, 128>}, {transform_indices = @transform_1, window_bounds = array<i64: 128, 128>}, {transform_indices = @transform_2, window_bounds = array<i64: 1, 128>}, {transform_indices = @transform_3, window_bounds = array<i64: 16, 128>}]} {
    %c0_i32 = arith.constant 0 : i32
    %0 = arith.cmpi eq, %arg2, %c0_i32 : i32
    %1 = arith.extui %0 : i1 to i32
    %c0_i32_0 = arith.constant 0 : i32
    %2 = arith.cmpi ne, %1, %c0_i32_0 : i32
    scf.if %2 {
      %cst_10 = arith.constant 0.000000e+00 : f32
      %12 = vector.broadcast %cst_10 : f32 to vector<16x128xf32>
      %c0_11 = arith.constant 0 : index
      %c0_12 = arith.constant 0 : index
      %13 = vector.load %arg7[%c0_11, %c0_12] : memref<16x128xf32, #tpu.memory_space<vmem>>, vector<16x128xf32>
      tpu.vector_store %arg7[%c0_11, %c0_12], %12 {strides = array<i32>} : memref<16x128xf32, #tpu.memory_space<vmem>>, vector<16x128xf32>,
    } else {
    }
    %c0 = arith.constant 0 : index
    %c0_1 = arith.constant 0 : index
    %3 = vector.load %arg7[%c0, %c0_1] : memref<16x128xf32, #tpu.memory_space<vmem>>, vector<16x128xf32>
    %c0_2 = arith.constant 0 : index
    %c0_3 = arith.constant 0 : index
    %4 = vector.load %arg3[%c0_2, %c0_3] : memref<16x128xbf16, #tpu.memory_space<vmem>>, vector<16x128xbf16>
    %c0_4 = arith.constant 0 : index
    %c0_5 = arith.constant 0 : index
    %5 = vector.load %arg4[%c0_4, %c0_5] : memref<128x128xbf16, #tpu.memory_space<vmem>>, vector<128x128xbf16>
    %cst = arith.constant dense<0.000000e+00> : vector<16x128xf32>
    %6 = tpu.matmul %4, %5, %cst {dimension_numbers = #tpu.dot_dimension_numbers<[1], [0], [0], [1], [0, 0, 1, 1], [], []>} : vector<16x128xbf16>, vector<128x128xbf16>, vector<16x128xf32> -> vector<16x128xf32>
    %7 = arith.addf %3, %6 : vector<16x128xf32>
    %c0_6 = arith.constant 0 : index
    %c0_7 = arith.constant 0 : index
    %8 = vector.load %arg7[%c0_6, %c0_7] : memref<16x128xf32, #tpu.memory_space<vmem>>, vector<16x128xf32>
    tpu.vector_store %arg7[%c0_6, %c0_7], %7 {strides = array<i32>} : memref<16x128xf32, #tpu.memory_space<vmem>>, vector<16x128xf32>,
    %c0_i32_8 = arith.constant 0 : i32
    %9 = arith.cmpi eq, %arg2, %c0_i32_8 : i32
    %10 = arith.extui %9 : i1 to i32
    %c0_i32_9 = arith.constant 0 : i32
    %11 = arith.cmpi ne, %10, %c0_i32_9 : i32
    scf.if %11 {
      %c0_10 = arith.constant 0 : index
      %c0_11 = arith.constant 0 : index
      %12 = vector.load %arg7[%c0_10, %c0_11] : memref<16x128xf32, #tpu.memory_space<vmem>>, vector<16x128xf32>
      %c0_12 = arith.constant 0 : index
      %c0_13 = arith.constant 0 : index
      %13 = vector.load %arg5[%c0_12, %c0_13] : memref<1x128xbf16, #tpu.memory_space<vmem>>, vector<1x128xbf16>
      %14 = arith.extf %13 : vector<1x128xbf16> to vector<1x128xf32>
      %15 = vector.broadcast %14 : vector<1x128xf32> to vector<16x128xf32>
      %16 = arith.addf %12, %15 : vector<16x128xf32>
      %cst_14 = arith.constant 0.000000e+00 : f32
      %17 = vector.broadcast %cst_14 : f32 to vector<16x128xf32>
      %18 = arith.maximumf %16, %17 : vector<16x128xf32>
      %19 = arith.truncf %18 : vector<16x128xf32> to vector<16x128xbf16>
      %c0_15 = arith.constant 0 : index
      %c0_16 = arith.constant 0 : index
      %20 = vector.load %arg6[%c0_15, %c0_16] : memref<16x128xbf16, #tpu.memory_space<vmem>>, vector<16x128xbf16>
      tpu.vector_store %arg6[%c0_15, %c0_16], %19 {strides = array<i32>} : memref<16x128xbf16, #tpu.memory_space<vmem>>, vector<16x128xbf16>,
    } else {
    }
    return
  }
  func.func @transform_0(%arg0: i32, %arg1: i32, %arg2: i32) -> (i32, i32) {
    %c0_i32 = arith.constant 0 : i32
    return %arg0, %arg2 : i32, i32
  }
  func.func @transform_1(%arg0: i32, %arg1: i32, %arg2: i32) -> (i32, i32) {
    %c0_i32 = arith.constant 0 : i32
    return %arg2, %arg1 : i32, i32
  }
  func.func @transform_2(%arg0: i32, %arg1: i32, %arg2: i32) -> (i32, i32) {
    %c0_i32 = arith.constant 0 : i32
    %c0_i32_0 = arith.constant 0 : i32
    return %c0_i32, %arg1 : i32, i32
  }
  func.func @transform_3(%arg0: i32, %arg1: i32, %arg2: i32) -> (i32, i32) {
    %c0_i32 = arith.constant 0 : i32
    return %arg0, %arg1 : i32, i32
  }
}

</mosaic_0001>

<bundles_post_ra>
// kernel: decoder_block_forward.22
= control target key start
LH: loop header
LB: loop body
LE: loop exit
PB: predicated region body
PF: predicated region fallthrough
CT: control target
= control target key end

     0   :  { %v225_v0 = vmov 0.0   ;;  %vm226_vm0 = vmmov 0   ;;  %v147_v10 = vlaneseq  ;;  %s280_s1 = inlined_call_operand.vmem [shape: bf16[128,128], index: 1, kind: input, shape index: {}]   ;;  %s281_s0 = inlined_call_operand.vmem [shape: bf16[16,128], index: 0, kind: input, shape index: {}]   ;;  %s282_s2 = inlined_call_operand.vmem [shape: bf16[1,128], index: 2, kind: input, shape index: {}]   ;;  %s283_s3 = inlined_call_operand.vmem [shape: bf16[16,128], index: 3, kind: output, shape index: {}]  }
   0x1   :  { %194 = vmatprep.subr.bf16.mxu0 %v225_v0  ;;  %v216_v1 = vld [vmem:[%s280_s1] sm:$0xff]   ;;  %210 = vmatprep.mubr.msk.bf16.mxu0 %vm226_vm0, %v225_v0  ;;  %v217_v2 = vld [vmem:[%s280_s1 + $0x8] sm:$0xff]   ;;  %v218_v3 = vld [vmem:[%s280_s1 + $0x10] sm:$0xff]  }
   0x2   :  { %195 = vmatpush3.bf16.msra.mxu0 %v216_v1  ;;  %v219_v4 = vld [vmem:[%s280_s1 + $0x18] sm:$0xff]   ;;  %v220_v5 = vld [vmem:[%s280_s1 + $0x20] sm:$0xff]   ;;  %v221_v6 = vld [vmem:[%s280_s1 + $0x28] sm:$0xff]   ;;  %v148_v11 = vshrl.u32 %v147_v10, 7 }
   0x3   :  { %196 = vmatprep.subr.bf16.mxu0 %v225_v0  ;;  %v222_v7 = vld [vmem:[%s280_s1 + $0x30] sm:$0xff]   ;;  %v223_v8 = vld [vmem:[%s280_s1 + $0x38] sm:$0xff]   ;;  %v224_v9 = vld [vmem:[%s281_s0] sm:$0xff]  }
   0x4   :  { %v145_v12 = vld [vmem:[%s282_s2] sm:$0x1]  ;;  %v149_v14 = vsub.s32 0, %v148_v11 }
   0x5   :  { %v146_v13 = vunpack.c.l.bf16 %v145_v12 }
   0x6   :  { %197 = vmatpush3.bf16.msra.mxu0 %v217_v2 }
   0x7   :  { %198 = vmatprep.subr.bf16.mxu0 %v225_v0  ;;  %v150_v15 = vrot.slane %v146_v13, %v149_v14 }
   0xa   :  { %199 = vmatpush3.bf16.msra.mxu0 %v218_v3 }
   0xb   :  { %200 = vmatprep.subr.bf16.mxu0 %v225_v0 }
   0xe   :  { %201 = vmatpush3.bf16.msra.mxu0 %v219_v4 }
   0xf   :  { %202 = vmatprep.subr.bf16.mxu0 %v225_v0 }
  0x12   :  { %203 = vmatpush3.bf16.msra.mxu0 %v220_v5 }
  0x13   :  { %204 = vmatprep.subr.bf16.mxu0 %v225_v0 }
  0x16   :  { %205 = vmatpush3.bf16.msra.mxu0 %v221_v6 }
  0x17   :  { %206 = vmatprep.subr.bf16.mxu0 %v225_v0 }
  0x1a   :  { %207 = vmatpush3.bf16.msra.mxu0 %v222_v7 }
  0x1b   :  { %208 = vmatprep.subr.bf16.mxu0 %v225_v0 }
  0x1e   :  { %209 = vmatpush3.bf16.msra.mxu0 %v223_v8 }
  0x21   :  { %211 = vmatmul.mubr.bf16.vlgmr.msra.gmra.mrb[0].mxu0 %v224_v9 }
  0xf4   :  { %v129_v16 = vpop.f32.mrb[0].mxu0 }
  0xf5   :  { %v212_v17 = vpop.f32.mrb[1].mxu0  ;;  %v151_v19 = vadd.f32 %v150_v15, %v129_v16 }
  0xf6   :  { %v132_v18 = vpop.f32.mrb[2].mxu0 }
  0xf7   :  { %v152_v20 = vadd.f32 %v150_v15, %v132_v18  ;;  %v213_v21 = vpop.f32.mrb[3].mxu0 }
  0xf9   :  { %v183_v22 = vpack.c.bf16 %v152_v20, %v151_v19 }
  0xfb   :  { %184 = vst [vmem:[%s283_s3] sm:$0xff] %v183_v22  }

// kernel: decoder_block_forward.19
= control target key start
LH: loop header
LB: loop body
LE: loop exit
PB: predicated region body
PF: predicated region fallthrough
CT: control target
= control target key end

     0   :  { %s818_s12 = smov 0   ;;  %s820_s13 = smov 0   ;;  %s920_s0 = inlined_call_operand.vmem [shape: bf16[16,128], index: 0, kind: input, shape index: {}]   ;;  %s921_s1 = inlined_call_operand.vmem [shape: bf16[128,384], index: 1, kind: input, shape index: {}]   ;;  %s922_s2 = inlined_call_operand.vmem [shape: bf16[1,384], index: 2, kind: input, shape index: {}]   ;;  %s923_s3 = inlined_call_operand.vmem [shape: bf16[16,384], index: 3, kind: output, shape index: {}]  }
   0x1   :  { %s822_s14 = smov 0   ;;  %s824_s15 = smov 0  }
   0x2   :  { %s826_s16 = smov 0  }
   0x3 LB: > { %s28_s17 = sadd.s32 1, %s790_s15  ;;  %s644_s18 = sadd.s32 4294967295, %s794_s16   ;;  %s794_s16 = sphi %s826_s16, %s13_s16   ;;  %s790_s15 = sphi %s824_s15, %s928_s15   ;;  %s786_s14 = sphi %s822_s14, %s927_s14   ;;  %s782_s13 = sphi %s820_s13, %s926_s13   ;;  %s778_s12 = sphi %s818_s12, %s925_s12  }
   0x4   : > { %p30_p0 = scmp.ge.s32.totalorder %s28_s17, 3  ;;  %p76_p1 = scmp.ne.s32.totalorder %s782_s13, %s778_s12 }
   0x5   : > { %p77_p2 = scmp.eq.s32.totalorder %s794_s16, 0  ;;  %p134_p4 = scmp.eq.s32.totalorder %s644_s18, 2 }
   0x6   : > { %s930_s17 = smov (%p30_p0, %s28_s17), 0  ;;  %s69_s20 = sadd.s32 1, %s782_s13 }
   0x7   : > { %p78_p3 = por %p77_p2, %p76_p1  ;;  %s65_s19 = ssub.s32 %s790_s15, %s930_s17 }
   0x8   : > { %p67_p5 = scmp.eq.s32.totalorder %s65_s19, 0  ;;  %p853_p6 = por %p134_p4, %p76_p1 }
   0x9   : > { %p648_p7 = scmp.ge.s32.totalorder %s794_s16, 3 }
   0xa   : > { %s858_s22 = scalar_select %p67_p5, %s782_s13, %s69_s20  }
   0xb   : > { %168 = sbr.rel (%p648_p7) target bundleno = 32 (0x20), region = 20 }
  0x12   : > { %171 = sbr.rel (!%p78_p3) target bundleno = 32 (0x20), region = 24  ;;  %s173_s23 = sand.u32 (%p78_p3), 1, %s782_s13  }
  0x13   : > { %s650_s24 = sshll.u32 (%p78_p3), %s790_s15, 2  ;;  %s649_s25 = sshll.u32 (%p78_p3), %s173_s23, 6 }
  0x14   : > { %s866_s28 = scalar_lea.vmem (%p78_p3), %s921_s1, %s650_s24  ;;  %s175_s29 = scalar_lea.vmem (%p78_p3), [#allocation3], %s649_s25 }
  0x15   : > { %v196_v0 = vld [vmem:[%s866_s28] sm:$0xf] (%p78_p3)  ;;  %v198_v1 = vld [vmem:[%s866_s28 + $0xc] sm:$0xf] (%p78_p3)  ;;  %v200_v2 = vld [vmem:[%s866_s28 + $0x18] sm:$0xf] (%p78_p3) }
  0x16   : > { %197 = vst [vmem:[%s175_s29] sm:$0xf] (%p78_p3), %v196_v0  ;;  %199 = vst [vmem:[%s175_s29 + $0x4] sm:$0xf] (%p78_p3), %v198_v1  ;;  %v202_v3 = vld [vmem:[%s866_s28 + $0x24] sm:$0xf] (%p78_p3) }
  0x17   : > { %v204_v4 = vld [vmem:[%s866_s28 + $0x30] sm:$0xf] (%p78_p3)  ;;  %201 = vst [vmem:[%s175_s29 + $0x8] sm:$0xf] (%p78_p3), %v200_v2  ;;  %203 = vst [vmem:[%s175_s29 + $0xc] sm:$0xf] (%p78_p3), %v202_v3 }
  0x18   : > { %205 = vst [vmem:[%s175_s29 + $0x10] sm:$0xf] (%p78_p3), %v204_v4  ;;  %v206_v5 = vld [vmem:[%s866_s28 + $0x3c] sm:$0xf] (%p78_p3)  ;;  %v208_v6 = vld [vmem:[%s866_s28 + $0x48] sm:$0xf] (%p78_p3) }
  0x19   : > { %v210_v7 = vld [vmem:[%s866_s28 + $0x54] sm:$0xf]  ;;  %207 = vst [vmem:[%s175_s29 + $0x14] sm:$0xf] %v206_v5  ;;  %209 = vst [vmem:[%s175_s29 + $0x18] sm:$0xf] %v208_v6 }
  0x1a   : > { %211 = vst [vmem:[%s175_s29 + $0x1c] sm:$0xf] %v210_v7  ;;  %v212_v8 = vld [vmem:[%s866_s28 + $0x60] sm:$0xf]  ;;  %v214_v9 = vld [vmem:[%s866_s28 + $0x6c] sm:$0xf] }
  0x1b   : > { %v216_v10 = vld [vmem:[%s866_s28 + $0x78] sm:$0xf]  ;;  %213 = vst [vmem:[%s175_s29 + $0x20] sm:$0xf] %v212_v8  ;;  %215 = vst [vmem:[%s175_s29 + $0x24] sm:$0xf] %v214_v9 }
  0x1c   : > { %217 = vst [vmem:[%s175_s29 + $0x28] sm:$0xf] %v216_v10  ;;  %v218_v11 = vld [vmem:[%s866_s28 + $0x84] sm:$0xf]  ;;  %v220_v12 = vld [vmem:[%s866_s28 + $0x90] sm:$0xf] }
  0x1d   : > { %v222_v13 = vld [vmem:[%s866_s28 + $0x9c] sm:$0xf]  ;;  %219 = vst [vmem:[%s175_s29 + $0x2c] sm:$0xf] %v218_v11  ;;  %221 = vst [vmem:[%s175_s29 + $0x30] sm:$0xf] %v220_v12 }
  0x1e   : > { %223 = vst [vmem:[%s175_s29 + $0x34] sm:$0xf] %v222_v13  ;;  %v224_v14 = vld [vmem:[%s866_s28 + $0xa8] sm:$0xf]  ;;  %v226_v15 = vld [vmem:[%s866_s28 + $0xb4] sm:$0xf] }
  0x1f   : > { %225 = vst [vmem:[%s175_s29 + $0x38] sm:$0xf] %v224_v14  ;;  %227 = vst [vmem:[%s175_s29 + $0x3c] sm:$0xf] %v226_v15 }
  0x20 PF: > { %p651_p8 = scmp.ge.s32.totalorder %s794_s16, 1  ;;  %p287_p9 = scmp.lt.s32.totalorder %s794_s16, 4 }
  0x22   : > { %p288_p10 = pnand %p651_p8, %p287_p9 }
  0x23   : > { %s294_s30 = sand.u32 (!%p288_p10), 1, %s778_s12   ;;  %v796_v16 = vmov (!%p288_p10), 0.0   ;;  %vm797_vm0 = vmmov (!%p288_p10), 0   ;;  %v755_v25 = vld [vmem:[%s920_s0] sm:$0xff] (!%p288_p10)   ;;  %p337_p11 = scmp.lt.s32.totalorder (!%p288_p10), %s786_s14, 2  ;;  %v474_v26 = vlaneseq (!%p288_p10) }
  0x24   : > { %291 = sbr.rel (%p288_p10) target bundleno = 297 (0x129), region = 69  ;;  %685 = vmatprep.subr.bf16.mxu0 (!%p288_p10), %v796_v16  ;;  %s652_s4 = sshll.u32 (!%p288_p10), %s294_s30, 6  ;;  %701 = vmatprep.mubr.msk.bf16.mxu0 (!%p288_p10), %vm797_vm0, %v796_v16 }
  0x25   : > { %s296_s5 = scalar_lea.vmem (!%p288_p10), [#allocation3], %s652_s4  ;;  %v475_v27 = vshrl.u32 (!%p288_p10), %v474_v26, 7  ;;  %s653_s18 = sshll.u32 (!%p288_p10), %s294_s30, 3 }
  0x26   : > { %v747_v17 = vld [vmem:[%s296_s5] sm:$0xff] (!%p288_p10)   ;;  %v748_v18 = vld [vmem:[%s296_s5 + $0x8] sm:$0xff] (!%p288_p10)   ;;  %v749_v19 = vld [vmem:[%s296_s5 + $0x10] sm:$0xff] (!%p288_p10)   ;;  %s326_s19 = scalar_lea.vmem (!%p288_p10), [#allocation4], %s653_s18 }
  0x27   : > { %686 = vmatpush3.bf16.msra.mxu0 (!%p288_p10), %v747_v17  ;;  %v750_v20 = vld [vmem:[%s296_s5 + $0x18] sm:$0xff] (!%p288_p10)   ;;  %v751_v21 = vld [vmem:[%s296_s5 + $0x20] sm:$0xff] (!%p288_p10)   ;;  %v752_v22 = vld [vmem:[%s296_s5 + $0x28] sm:$0xff] (!%p288_p10)   ;;  %v476_v30 = vsub.s32 (!%p288_p10), 0, %v475_v27 }
  0x28   : > { %687 = vmatprep.subr.bf16.mxu0 (!%p288_p10), %v796_v16  ;;  %v753_v23 = vld [vmem:[%s296_s5 + $0x30] sm:$0xff] (!%p288_p10)   ;;  %v754_v24 = vld [vmem:[%s296_s5 + $0x38] sm:$0xff] (!%p288_p10)  }
  0x2b   : > { %688 = vmatpush3.bf16.msra.mxu0 %v748_v18  ;;  %s338_s8 = scalar_select %p337_p11, %s786_s14, 2 }
  0x2c   : > { %689 = vmatprep.subr.bf16.mxu0 %v796_v16  ;;  %s666_s20 = sshll.u32 (%p853_p6), %s786_s14, 2 }
  0x2d   : > { %s339_s11 = scalar_lea.vmem %s922_s2, %s338_s8  ;;  %s501_s25 = scalar_lea.vmem (%p853_p6), %s923_s3, %s666_s20 }
  0x2e   : > { %v472_v28 = vld [vmem:[%s339_s11] sm:$0x1] }
  0x2f   : > { %690 = vmatpush3.bf16.msra.mxu0 %v749_v19  ;;  %v473_v29 = vunpack.c.l.bf16 %v472_v28 }
  0x30   : > { %691 = vmatprep.subr.bf16.mxu0 %v796_v16 }
  0x31   : > { %v477_v31 = vrot.slane %v473_v29, %v476_v30 }
  0x33   : > { %692 = vmatpush3.bf16.msra.mxu0 %v750_v20 }
  0x34   : > { %693 = vmatprep.subr.bf16.mxu0 %v796_v16 }
  0x37   : > { %694 = vmatpush3.bf16.msra.mxu0 %v751_v21 }
  0x38   : > { %695 = vmatprep.subr.bf16.mxu0 %v796_v16 }
  0x3b   : > { %696 = vmatpush3.bf16.msra.mxu0 %v752_v22 }
  0x3c   : > { %697 = vmatprep.subr.bf16.mxu0 %v796_v16 }
  0x3f   : > { %698 = vmatpush3.bf16.msra.mxu0 %v753_v23 }
  0x40   : > { %699 = vmatprep.subr.bf16.mxu0 %v796_v16 }
  0x43   : > { %700 = vmatpush3.bf16.msra.mxu0 %v754_v24 }
  0x46   : > { %702 = vmatmul.mubr.bf16.vlgmr.msra.gmra.mrb[0].mxu0 %v755_v25 }
 0x119   : > { %v456_v32 = vpop.f32.mrb[0].mxu0 }
 0x11a   : > { %v703_v33 = vpop.f32.mrb[1].mxu0  ;;  %v478_v35 = vadd.f32 %v477_v31, %v456_v32  ;;  %496 = sbr.rel (!%p853_p6) target bundleno = 297 (0x129), region = 85 }
 0x11b   : > { %v459_v34 = vpop.f32.mrb[2].mxu0 }
 0x11c   : > { %v479_v36 = vadd.f32 %v477_v31, %v459_v34  ;;  %v704_v37 = vpop.f32.mrb[3].mxu0 }
 0x11e   : > { %v674_v38 = vpack.c.bf16 %v479_v36, %v478_v35 }
 0x120   : > { %675 = vst [vmem:[%s326_s19] sm:$0xff] %v674_v38  }
 0x127   : > { %v517_v39 = vld [vmem:[%s326_s19] sm:$0xf]  ;;  %v519_v40 = vld [vmem:[%s326_s19 + $0x4] sm:$0xf] }
 0x128   : > { %518 = vst [vmem:[%s501_s25] sm:$0xf] %v517_v39  ;;  %520 = vst [vmem:[%s501_s25 + $0xc] sm:$0xf] %v519_v40 }
 0x129 PF: > { %s13_s16 = sadd.s32 1, %s794_s16   ;;  %s925_s12 = smov %s782_s13 }
 0x12a   : > { %p10_p12 = scmp.ge.s32.totalorder %s13_s16, 5   ;;  %s926_s13 = smov %s858_s22 }
 0x12b   : > { %s927_s14 = smov %s790_s15  ;;  %s928_s15 = smov %s930_s17 }
 0x12c   :  { %12 = sbr.rel (!%p10_p12) target bundleno = 3 (0x3), region = 163 }

// kernel: decoder_block_forward.20
= control target key start
LH: loop header
LB: loop body
LE: loop exit
PB: predicated region body
PF: predicated region fallthrough
CT: control target
= control target key end

     0   :  { %s790_s12 = smov 0   ;;  %s792_s13 = smov 0   ;;  %s866_s0 = inlined_call_operand.vmem [shape: bf16[2,4,8,8], index: 0, kind: input, shape index: {}]   ;;  %s867_s1 = inlined_call_operand.vmem [shape: bf16[2,4,8,8], index: 1, kind: input, shape index: {}]   ;;  %s868_s2 = inlined_call_operand.vmem [shape: bf16[2,4,8,8], index: 2, kind: input, shape index: {}]   ;;  %s869_s3 = inlined_call_operand.vmem [shape: bf16[2,4,8,8], index: 3, kind: output, shape index: {}]  }
   0x1   :  { %s794_s14 = smov 0   ;;  %s796_s15 = smov 0  }
   0x2   :  { %s798_s16 = smov 0  }
   0x3 LB: > { %s35_s17 = sadd.s32 1, %s756_s14  ;;  %s39_s18 = sadd.s32 1, %s760_s15  ;;  %s764_s16 = sphi %s798_s16, %s13_s16   ;;  %s760_s15 = sphi %s796_s15, %s873_s15   ;;  %s756_s14 = sphi %s794_s14, %s872_s14   ;;  %s752_s13 = sphi %s792_s13, %s871_s13   ;;  %s748_s12 = sphi %s790_s12, %s870_s12  }
   0x4   : > { %p37_p0 = scmp.ge.s32.totalorder %s35_s17, 4  ;;  %p645_p1 = scmp.ge.s32.totalorder %s764_s16, 1 }
   0x5   : > { %p217_p2 = scmp.lt.s32.totalorder %s764_s16, 9 }
   0x6   : > { %s875_s17 = smov (%p37_p0, %s35_s17), 0  ;;  %s877_s18 = smov (!%p37_p0, %s39_s18), %s760_s15 }
   0x7   : > { %p218_p3 = pnand %p645_p1, %p217_p2  ;;  %p41_p4 = scmp.ge.s32.totalorder %s877_s18, 2 }
   0x8   : > { %p275_p5 = scmp.lt.s32.totalorder (!%p218_p3), %s752_s13, 1  ;;  %p277_p6 = scmp.lt.s32.totalorder (!%p218_p3), %s748_s12, 3  ;;  %vm327_vm0 = vcmask (!%p218_p3), 64512   ;;  %v766_v0 = vmov (!%p218_p3), 0.0   ;;  %vm767_vm1 = vmmov (!%p218_p3), 0   ;;  %vm324_vm2 = vcmask (!%p218_p3), 7168  }
   0x9   : > { %s879_s18 = smov (%p41_p4, %s877_s18), 0  ;;  %221 = sbr.rel (%p218_p3) target bundleno = 829 (0x33d), region = 32 }
   0xa   : > { %662 = vmatprep.subr.bf16.mxu0 (!%p218_p3), %v766_v0  ;;  %328 = vst.msk [vmem:[#allocation4] sm:$0xff] (!%p218_p3), %vm327_vm0, %v766_v0  ;;  %664 = vmatprep.mubr.msk.bf16.mxu0 (!%p218_p3), %vm767_vm1, %v766_v0  ;;  %v768_v4 = vmov (!%p218_p3), -1e+30   ;;  %v386_v5 = vlaneseq (!%p218_p3)  ;;  %v769_v14 = vmov (!%p218_p3), 0   ;;  %vm432_vm4 = vcmask (!%p218_p3), 1043456  }
   0xb   : > { %668 = vmatprep.subr.bf16.mxu1 (!%p218_p3), %v766_v0  ;;  %670 = vmatprep.mubr.msk.bf16.mxu1 (!%p218_p3), %vm767_vm1, %v766_v0  ;;  %325 = vst.msk [vmem:[#allocation2] sm:$0xff] (!%p218_p3), %vm324_vm2, %v768_v4  ;;  %326 = vst.msk [vmem:[#allocation3] sm:$0xff] (!%p218_p3), %vm324_vm2, %v766_v0  ;;  %vm492_vm5 = vcmask (!%p218_p3), 60416  }
   0xc   : > { %v387_v6 = vshrl.u32 (!%p218_p3), %v386_v5, 7  ;;  %v391_v7 = vand.u32 (!%p218_p3), 127, %v386_v5  ;;  %718 = vset.pattern.permute.xlu0 (!%p218_p3), %v769_v14  ;;  %719 = vset.pattern.permute.xlu1 (!%p218_p3), %v769_v14 }
   0xe   : > { %vm394_vm3 = vcmp.ge.s32.totalorder (!%p218_p3), %v387_v6, %v391_v7 }
  0x10   : > { %s881_s13 = smov (!%p275_p5, %s752_s13), 1  ;;  %s883_s12 = smov (!%p277_p6, %s748_s12), 3 }
  0x11   : > { %s646_s19 = sshll.u32 %s881_s13, 2  ;;  %v421_v36 = vld [vmem:[#allocation4] sm:$0xff] }
  0x12   : > { %s283_s20 = sadd.s32 %s646_s19, %s883_s12  ;;  %v396_v15 = vld [vmem:[#allocation2] sm:$0xff]  ;;  %v413_v30 = vld [vmem:[#allocation3] sm:$0xff] }
  0x13   : > { %s821_s21 = sshll.u32 %s283_s20, 2 }
  0x14   : > { %s296_s24 = scalar_lea.vmem %s867_s1, %s821_s21  ;;  %s285_s27 = scalar_lea.vmem %s866_s0, %s821_s21 }
  0x15   : > { %v337_v1 = vld [vmem:[%s296_s24] sm:$0xf]  ;;  %s307_s30 = scalar_lea.vmem %s868_s2, %s821_s21  ;;  %s318_s6 = scalar_lea.vmem %s869_s3, %s821_s21 }
  0x16   : > { %v344_v2 = vsel %vm327_vm0, %v337_v1, 0  ;;  %v336_v3 = vld [vmem:[%s285_s27] sm:$0xf] }
  0x17   : > { %663 = vmatpush3.bf16.xpose.msra.mxu0 %v344_v2  ;;  %v338_v19 = vld [vmem:[%s307_s30] sm:$0xf] }
  0x18   : > { %v434_v20 = vsel %vm432_vm4, %v338_v19, 0 }
  0x19   : > { %669 = vmatpush3.bf16.msra.mxu1 %v434_v20 }
  0x1e   : > { %665 = vmatmul.mubr.msk.bf16.vlgmr.msra.gmra.mrb[0].mxu0 %vm327_vm0, %v336_v3 }
  0xf1   : > { %v380_v8 = vpop.f32.mrb[0].mxu0 }
  0xf2   : > { %v395_v9 = vsel %vm394_vm3, %v380_v8, -1e+30  ;;  %v666_v10 = vpop.f32.mrb[1].mxu0 }
  0xf3   : > { %v383_v11 = vpop.f32.mrb[2].mxu0  ;;  %v397_v12 = vsel %vm327_vm0, %v395_v9, -inf }
  0xf4   : > { %398 = vmax.xlane.f32.xlu0 %v397_v12  ;;  %v667_v13 = vpop.f32.mrb[3].mxu0 }
 0x181   : > { %v399_v16 = vpop.xlane.xlu0 %398 }
 0x182   : > { %v400_v17 = vmax.f32 %v396_v15, %v399_v16 }
 0x184   : > { %v401_v18 = vsub.f32 %v396_v15, %v400_v17  ;;  %478 = vst.msk [vmem:[#allocation2] sm:$0xff] %vm324_vm2, %v400_v17  ;;  %406 = vperm.xlu0 %718, %v400_v17  }
 0x186   : > { %v402_v28 = vmul.f32 1.442695, %v401_v18 }
 0x203   : > { %v407_v21 = vpop.permute.xlu0 %406 }
 0x204   : > { %v409_v22 = vsub.f32 %v395_v9, %v407_v21 }
 0x206   : > { %v410_v23 = vmul.f32 1.442695, %v409_v22 }
 0x208   : > { %720 = vpow2.f32 %v410_v23 }
 0x209   : > { %722 = vpow2.f32 %v402_v28 }
 0x212   : > { %v721_v24 = vpop.eup %720 }
 0x213   : > { %v412_v25 = vsel %vm394_vm3, %v721_v24, 0.0  ;;  %v723_v29 = vpop.eup %722 }
 0x214   : > { %v415_v26 = vsel %vm327_vm0, %v412_v25, 0.0  ;;  %v428_v27 = vpack.c.bf16 %v412_v25, %v412_v25  ;;  %v414_v31 = vmul.f32 %v723_v29, %v413_v30 }
 0x215   : > { %416 = vadd.xlane.f32.xlu1 %v415_v26 }
 0x216   : > { %671 = vmatmul.mubr.msk.bf16.vlgmr.msra.gmra.mrb[0].mxu1 %vm327_vm0, %v428_v27 }
 0x226   : > { %424 = vperm.xlu1 %719, %v723_v29  }
 0x2a2   : > { %v417_v32 = vpop.xlane.xlu1 %416 }
 0x2a3   : > { %v418_v33 = vadd.f32 %v417_v32, %v414_v31 }
 0x2a5   : > { %420 = vst.msk [vmem:[#allocation3] sm:$0xff] %vm324_vm2, %v418_v33 }
 0x2a6   : > { %v425_v37 = vpop.permute.xlu1 %424 }
 0x2a7   : > { %v427_v38 = vmul.f32 %v425_v37, %v421_v36 }
 0x2ac   : > { %v482_v34 = vld [vmem:[#allocation3] sm:$0xff] }
 0x2ad   : > { %724 = vrcp.f32 %v482_v34 }
 0x2b7   : > { %v725_v35 = vpop.eup %724 }
 0x2b8   : > { %487 = vperm.xlu1 %719, %v725_v35  }
 0x2e9   : > { %v470_v39 = vpop.f32.mrb[0].mxu1 }
 0x2ea   : > { %v476_v40 = vadd.f32 %v470_v39, %v427_v38  ;;  %v672_v41 = vpop.f32.mrb[1].mxu1 }
 0x2eb   : > { %v473_v42 = vpop.f32.mrb[2].mxu1 }
 0x2ec   : > { %477 = vst.msk [vmem:[#allocation4] sm:$0xff] %vm327_vm0, %v476_v40  ;;  %v673_v43 = vpop.f32.mrb[3].mxu1 }
 0x2f3   : > { %v484_v44 = vld [vmem:[#allocation4] sm:$0xff] }
 0x337   : > { %v488_v45 = vpop.permute.xlu1 %487 }
 0x338   : > { %v490_v46 = vmul.f32 %v488_v45, %v484_v44 }
 0x33a   : > { %v491_v47 = vpack.c.bf16 %v490_v46, %v490_v46 }
 0x33c   : > { %493 = vst.msk [vmem:[%s318_s6] sm:$0xf] %vm492_vm5, %v491_v47 }
 0x33d PF: > { %s13_s16 = sadd.s32 1, %s764_s16   ;;  %s870_s12 = smov %s756_s14 }
 0x33e   : > { %p10_p7 = scmp.ge.s32.totalorder %s13_s16, 10   ;;  %s871_s13 = smov %s760_s15 }
 0x33f   : > { %s872_s14 = smov %s875_s17  ;;  %s873_s15 = smov %s879_s18 }
 0x340   :  { %12 = sbr.rel (!%p10_p7) target bundleno = 3 (0x3), region = 80 }

// kernel: decoder_block_forward.21
= control target key start
LH: loop header
LB: loop body
LE: loop exit
PB: predicated region body
PF: predicated region fallthrough
CT: control target
= control target key end

     0   :  { %v292_v0 = vmov 0.0   ;;  %vm293_vm0 = vmmov 0   ;;  %v156_v10 = vlaneseq  ;;  %s371_s1 = inlined_call_operand.vmem [shape: bf16[128,128], index: 1, kind: input, shape index: {}]   ;;  %s372_s0 = inlined_call_operand.vmem [shape: bf16[16,128], index: 0, kind: input, shape index: {}]   ;;  %s373_s2 = inlined_call_operand.vmem [shape: bf16[1,128], index: 2, kind: input, shape index: {}]   ;;  %s374_s3 = inlined_call_operand.vmem [shape: bf16[16,128], index: 3, kind: input, shape index: {}]   ;;  %s375_s4 = inlined_call_operand.vmem [shape: bf16[1,128], index: 4, kind: input, shape index: {}]   ;;  %s376_s5 = inlined_call_operand.vmem [shape: bf16[1,128], index: 5, kind: input, shape index: {}]   ;;  %s377_s6 = inlined_call_operand.vmem [shape: bf16[16,128], index: 6, kind: output, shape index: {}]  }
   0x1   :  { %257 = vmatprep.subr.bf16.mxu0 %v292_v0  ;;  %v279_v1 = vld [vmem:[%s371_s1] sm:$0xff]   ;;  %273 = vmatprep.mubr.msk.bf16.mxu0 %vm293_vm0, %v292_v0  ;;  %v280_v2 = vld [vmem:[%s371_s1 + $0x8] sm:$0xff]   ;;  %v281_v3 = vld [vmem:[%s371_s1 + $0x10] sm:$0xff]  }
   0x2   :  { %258 = vmatpush3.bf16.msra.mxu0 %v279_v1  ;;  %v282_v4 = vld [vmem:[%s371_s1 + $0x18] sm:$0xff]   ;;  %v283_v5 = vld [vmem:[%s371_s1 + $0x20] sm:$0xff]   ;;  %v284_v6 = vld [vmem:[%s371_s1 + $0x28] sm:$0xff]   ;;  %v157_v11 = vshrl.u32 %v156_v10, 7 }
   0x3   :  { %259 = vmatprep.subr.bf16.mxu0 %v292_v0  ;;  %v285_v7 = vld [vmem:[%s371_s1 + $0x30] sm:$0xff]   ;;  %v286_v8 = vld [vmem:[%s371_s1 + $0x38] sm:$0xff]   ;;  %v287_v9 = vld [vmem:[%s372_s0] sm:$0xff]  }
   0x4   :  { %v154_v12 = vld [vmem:[%s373_s2] sm:$0x1]  ;;  %v158_v14 = vsub.s32 0, %v157_v11 }
   0x5   :  { %v155_v13 = vunpack.c.l.bf16 %v154_v12  ;;  %v240_v15 = vld [vmem:[%s374_s3] sm:$0xff]  }
   0x6   :  { %260 = vmatpush3.bf16.msra.mxu0 %v280_v2  ;;  %v241_v17 = vunpack.c.l.bf16 %v240_v15  ;;  %v242_v21 = vunpack.c.h.bf16 %v240_v15  ;;  %v196_v45 = vld [vmem:[%s375_s4] sm:$0x1] }
   0x7   :  { %261 = vmatprep.subr.bf16.mxu0 %v292_v0  ;;  %v159_v16 = vrot.slane %v155_v13, %v158_v14  ;;  %v197_v46 = vunpack.c.l.bf16 %v196_v45  ;;  %v204_v47 = vld [vmem:[%s376_s5] sm:$0x1] }
   0x8   :  { %v205_v51 = vunpack.c.l.bf16 %v204_v47 }
   0x9   :  { %v201_v50 = vrot.slane %v197_v46, %v158_v14 }
   0xa   :  { %262 = vmatpush3.bf16.msra.mxu0 %v281_v3  ;;  %v209_v55 = vrot.slane %v205_v51, %v158_v14 }
   0xb   :  { %263 = vmatprep.subr.bf16.mxu0 %v292_v0 }
   0xe   :  { %264 = vmatpush3.bf16.msra.mxu0 %v282_v4 }
   0xf   :  { %265 = vmatprep.subr.bf16.mxu0 %v292_v0 }
  0x12   :  { %266 = vmatpush3.bf16.msra.mxu0 %v283_v5 }
  0x13   :  { %267 = vmatprep.subr.bf16.mxu0 %v292_v0 }
  0x16   :  { %268 = vmatpush3.bf16.msra.mxu0 %v284_v6 }
  0x17   :  { %269 = vmatprep.subr.bf16.mxu0 %v292_v0 }
  0x1a   :  { %270 = vmatpush3.bf16.msra.mxu0 %v285_v7 }
  0x1b   :  { %271 = vmatprep.subr.bf16.mxu0 %v292_v0 }
  0x1e   :  { %272 = vmatpush3.bf16.msra.mxu0 %v286_v8 }
  0x21   :  { %274 = vmatmul.mubr.bf16.vlgmr.msra.gmra.mrb[0].mxu0 %v287_v9 }
  0xf4   :  { %v138_v18 = vpop.f32.mrb[0].mxu0 }
  0xf5   :  { %v160_v19 = vadd.f32 %v159_v16, %v138_v18  ;;  %v275_v20 = vpop.f32.mrb[1].mxu0 }
  0xf6   :  { %v141_v22 = vpop.f32.mrb[2].mxu0 }
  0xf7   :  { %v166_v23 = vadd.f32 %v241_v17, %v160_v19  ;;  %v161_v24 = vadd.f32 %v159_v16, %v141_v22  ;;  %v276_v25 = vpop.f32.mrb[3].mxu0 }
  0xf9   :  { %v167_v26 = vadd.f32 %v242_v21, %v161_v24  ;;  %168 = vadd.xlane.f32.xlu0 %v166_v23  ;;  %v174_v27 = vmul.f32 %v166_v23, %v166_v23 }
  0xfb   :  { %176 = vadd.xlane.f32.xlu1 %v174_v27  ;;  %v175_v28 = vmul.f32 %v167_v26, %v167_v26 }
  0xfd   :  { %170 = vadd.xlane.f32.xlu0 %v167_v26 }
  0xff   :  { %178 = vadd.xlane.f32.xlu1 %v175_v28 }
 0x186   :  { %v169_v29 = vpop.xlane.xlu0 %168 }
 0x187   :  { %v172_v30 = vmul.f32 0.03125, %v169_v29 }
 0x188   :  { %v177_v31 = vpop.xlane.xlu1 %176 }
 0x189   :  { %v182_v32 = vmul.f32 %v172_v30, %v172_v30  ;;  %v180_v33 = vmul.f32 0.03125, %v177_v31  ;;  %v188_v48 = vsub.f32 %v166_v23, %v172_v30 }
 0x18a   :  { %v171_v34 = vpop.xlane.xlu0 %170 }
 0x18b   :  { %v184_v35 = vsub.f32 %v180_v33, %v182_v32  ;;  %v173_v36 = vmul.f32 0.03125, %v171_v34 }
 0x18c   :  { %v179_v37 = vpop.xlane.xlu1 %178 }
 0x18d   :  { %v186_v38 = vmax.f32 %v184_v35, 0.0  ;;  %v183_v39 = vmul.f32 %v173_v36, %v173_v36  ;;  %v181_v40 = vmul.f32 0.03125, %v179_v37  ;;  %v189_v53 = vsub.f32 %v167_v26, %v173_v36 }
 0x18f   :  { %v190_v41 = vadd.f32 1e-05, %v186_v38  ;;  %v185_v42 = vsub.f32 %v181_v40, %v183_v39 }
 0x191   :  { %288 = vrsqrt.f32 %v190_v41  ;;  %v187_v43 = vmax.f32 %v185_v42, 0.0 }
 0x193   :  { %v191_v44 = vadd.f32 1e-05, %v187_v43 }
 0x195   :  { %290 = vrsqrt.f32 %v191_v44 }
 0x19b   :  { %v289_v49 = vpop.eup %288 }
 0x19c   :  { %v194_v52 = vmul.f32 %v289_v49, %v188_v48 }
 0x19e   :  { %v202_v56 = vmul.f32 %v201_v50, %v194_v52 }
 0x19f   :  { %v291_v54 = vpop.eup %290 }
 0x1a0   :  { %v195_v57 = vmul.f32 %v291_v54, %v189_v53  ;;  %v210_v59 = vadd.f32 %v209_v55, %v202_v56 }
 0x1a2   :  { %v203_v58 = vmul.f32 %v201_v50, %v195_v57 }
 0x1a4   :  { %v211_v60 = vadd.f32 %v209_v55, %v203_v58 }
 0x1a6   :  { %v246_v61 = vpack.c.bf16 %v211_v60, %v210_v59 }
 0x1a8   :  { %247 = vst [vmem:[%s377_s6] sm:$0xff] %v246_v61  }

// kernel: decoder_block_forward.23
= control target key start
LH: loop header
LB: loop body
LE: loop exit
PB: predicated region body
PF: predicated region fallthrough
CT: control target
= control target key end

     0   :  { %v279_v1 = vmov 0   ;;  %v192_v18 = vlaneseq  ;;  %s360_s1 = inlined_call_operand.vmem [shape: bf16[128,256], index: 1, kind: input, shape index: {}]   ;;  %s361_s0 = inlined_call_operand.vmem [shape: bf16[16,128], index: 0, kind: input, shape index: {}]   ;;  %s362_s2 = inlined_call_operand.vmem [shape: bf16[1,256], index: 2, kind: input, shape index: {}]   ;;  %s363_s3 = inlined_call_operand.vmem [shape: bf16[16,256], index: 3, kind: output, shape index: {}]  }
   0x1   :  { %v254_v0 = vld [vmem:[%s360_s1 + $0x4] ss:$8 sps:$4 sm:$0xff]   ;;  %163 = vmatprep.mubr.bf16.mxu0 %v279_v1  ;;  %v256_v2 = vld [vmem:[%s360_s1] ss:$8 sps:$4 sm:$0xff]   ;;  %v257_v3 = vld [vmem:[%s360_s1 + $0x14] ss:$8 sps:$4 sm:$0xff]  }
   0x2   :  { %131 = vmatprep.subr.bf16.mxu0 %v254_v0  ;;  %v259_v4 = vld [vmem:[%s360_s1 + $0x10] ss:$8 sps:$4 sm:$0xff]   ;;  %v260_v5 = vld [vmem:[%s360_s1 + $0x24] ss:$8 sps:$4 sm:$0xff]   ;;  %v262_v6 = vld [vmem:[%s360_s1 + $0x20] ss:$8 sps:$4 sm:$0xff]  }
   0x3   :  { %132 = vmatpush1.bf16.msra.mxu0 %v256_v2  ;;  %v263_v7 = vld [vmem:[%s360_s1 + $0x34] ss:$8 sps:$4 sm:$0xff]   ;;  %v265_v8 = vld [vmem:[%s360_s1 + $0x30] ss:$8 sps:$4 sm:$0xff]   ;;  %v266_v9 = vld [vmem:[%s360_s1 + $0x44] ss:$8 sps:$4 sm:$0xff]  }
   0x4   :  { %133 = vmatprep.subr.bf16.mxu0 %v257_v3  ;;  %v268_v10 = vld [vmem:[%s360_s1 + $0x40] ss:$8 sps:$4 sm:$0xff]   ;;  %v269_v11 = vld [vmem:[%s360_s1 + $0x54] ss:$8 sps:$4 sm:$0xff]   ;;  %v271_v12 = vld [vmem:[%s360_s1 + $0x50] ss:$8 sps:$4 sm:$0xff]  }
   0x5   :  { %v272_v13 = vld [vmem:[%s360_s1 + $0x64] ss:$8 sps:$4 sm:$0xff]   ;;  %v274_v14 = vld [vmem:[%s360_s1 + $0x60] ss:$8 sps:$4 sm:$0xff]   ;;  %v275_v15 = vld [vmem:[%s360_s1 + $0x74] ss:$8 sps:$4 sm:$0xff]  }
   0x6   :  { %v277_v16 = vld [vmem:[%s360_s1 + $0x70] ss:$8 sps:$4 sm:$0xff]   ;;  %v278_v17 = vld [vmem:[%s361_s0] sm:$0xff]   ;;  %v193_v19 = vshrl.u32 %v192_v18, 7 }
   0x7   :  { %134 = vmatpush1.bf16.msra.mxu0 %v259_v4  ;;  %v189_v20 = vld [vmem:[%s362_s2] sm:$0x3] }
   0x8   :  { %135 = vmatprep.subr.bf16.mxu0 %v260_v5  ;;  %v190_v21 = vunpack.c.l.bf16 %v189_v20  ;;  %v194_v22 = vsub.s32 0, %v193_v19  ;;  %v198_v23 = vsub.s32 2, %v193_v19 }
   0xa   :  { %v195_v24 = vrot.slane %v190_v21, %v194_v22  ;;  %v199_v25 = vrot.slane %v190_v21, %v198_v23 }
   0xb   :  { %136 = vmatpush1.bf16.msra.mxu0 %v262_v6 }
   0xc   :  { %137 = vmatprep.subr.bf16.mxu0 %v263_v7  ;;  %v205_v26 = vrot.slane %v195_v24, %v194_v22  ;;  %v209_v27 = vrot.slane %v199_v25, %v194_v22 }
   0xf   :  { %138 = vmatpush1.bf16.msra.mxu0 %v265_v8 }
  0x10   :  { %139 = vmatprep.subr.bf16.mxu0 %v266_v9 }
  0x13   :  { %140 = vmatpush1.bf16.msra.mxu0 %v268_v10 }
  0x14   :  { %141 = vmatprep.subr.bf16.mxu0 %v269_v11 }
  0x17   :  { %142 = vmatpush1.bf16.msra.mxu0 %v271_v12 }
  0x18   :  { %143 = vmatprep.subr.bf16.mxu0 %v272_v13 }
  0x1b   :  { %144 = vmatpush1.bf16.msra.mxu0 %v274_v14 }
  0x1c   :  { %145 = vmatprep.subr.bf16.mxu0 %v275_v15 }
  0x1f   :  { %146 = vmatpush1.bf16.msra.mxu0 %v277_v16 }
  0x22   :  { %164 = vmatmul.mubr.bf16.vlgmr.msra.gmra.mrb[0].mxu0 %v278_v17 }
  0xf5   :  { %v165_v28 = vpop.f32.mrb[0].mxu0 }
  0xf6   :  { %v210_v29 = vadd.f32 %v205_v26, %v165_v28  ;;  %v167_v30 = vpop.f32.mrb[1].mxu0 }
  0xf7   :  { %v211_v31 = vadd.f32 %v209_v27, %v167_v30  ;;  %v169_v32 = vpop.f32.mrb[2].mxu0 }
  0xf8   :  { %v212_v33 = vadd.f32 %v205_v26, %v169_v32  ;;  %v171_v34 = vpop.f32.mrb[3].mxu0 }
  0xf9   :  { %v251_v35 = vpack.c.bf16 %v211_v31, %v210_v29  ;;  %v213_v36 = vadd.f32 %v209_v27, %v171_v34 }
  0xfb   :  { %226 = vst [vmem:[%s363_s3] sm:$0xff] %v251_v35  ;;  %v252_v37 = vpack.c.bf16 %v213_v36, %v212_v33 }
  0xfd   :  { %227 = vst [vmem:[%s363_s3 + $0x8] sm:$0xff] %v252_v37 }

// kernel: decoder_block_forward.24
= control target key start
LH: loop header
LB: loop body
LE: loop exit
PB: predicated region body
PF: predicated region fallthrough
CT: control target
= control target key end

     0   :  { %s772_s12 = smov 0   ;;  %s774_s13 = smov 0   ;;  %s846_s0 = inlined_call_operand.vmem [shape: bf16[2,4,8,8], index: 0, kind: input, shape index: {}]   ;;  %s847_s1 = inlined_call_operand.vmem [shape: bf16[2,4,8,8], index: 1, kind: input, shape index: {}]   ;;  %s848_s2 = inlined_call_operand.vmem [shape: bf16[2,4,8,8], index: 2, kind: input, shape index: {}]   ;;  %s849_s3 = inlined_call_operand.vmem [shape: bf16[2,4,8,8], index: 3, kind: output, shape index: {}]  }
   0x1   :  { %s776_s14 = smov 0   ;;  %s778_s15 = smov 0  }
   0x2   :  { %s780_s16 = smov 0  }
   0x3 LB: > { %s35_s17 = sadd.s32 1, %s738_s14  ;;  %s39_s18 = sadd.s32 1, %s742_s15  ;;  %s746_s16 = sphi %s780_s16, %s13_s16   ;;  %s742_s15 = sphi %s778_s15, %s853_s15   ;;  %s738_s14 = sphi %s776_s14, %s852_s14   ;;  %s734_s13 = sphi %s774_s13, %s851_s13   ;;  %s730_s12 = sphi %s772_s12, %s850_s12  }
   0x4   : > { %p37_p0 = scmp.ge.s32.totalorder %s35_s17, 4  ;;  %p627_p1 = scmp.ge.s32.totalorder %s746_s16, 1 }
   0x5   : > { %p217_p2 = scmp.lt.s32.totalorder %s746_s16, 9 }
   0x6   : > { %s855_s17 = smov (%p37_p0, %s35_s17), 0  ;;  %s857_s18 = smov (!%p37_p0, %s39_s18), %s742_s15 }
   0x7   : > { %p218_p3 = pnand %p627_p1, %p217_p2  ;;  %p41_p4 = scmp.ge.s32.totalorder %s857_s18, 2 }
   0x8   : > { %p275_p5 = scmp.lt.s32.totalorder (!%p218_p3), %s734_s13, 1  ;;  %p277_p6 = scmp.lt.s32.totalorder (!%p218_p3), %s730_s12, 3  ;;  %vm327_vm0 = vcmask (!%p218_p3), 64512   ;;  %v748_v0 = vmov (!%p218_p3), 0.0   ;;  %vm749_vm1 = vmmov (!%p218_p3), 0   ;;  %vm324_vm2 = vcmask (!%p218_p3), 7168  }
   0x9   : > { %s859_s18 = smov (%p41_p4, %s857_s18), 0  ;;  %221 = sbr.rel (%p218_p3) target bundleno = 827 (0x33b), region = 32 }
   0xa   : > { %644 = vmatprep.subr.bf16.mxu0 (!%p218_p3), %v748_v0  ;;  %328 = vst.msk [vmem:[#allocation4] sm:$0xff] (!%p218_p3), %vm327_vm0, %v748_v0  ;;  %646 = vmatprep.mubr.msk.bf16.mxu0 (!%p218_p3), %vm749_vm1, %v748_v0  ;;  %v750_v4 = vmov (!%p218_p3), -1e+30   ;;  %v751_v10 = vmov (!%p218_p3), 0   ;;  %vm414_vm3 = vcmask (!%p218_p3), 1043456   ;;  %vm474_vm4 = vcmask (!%p218_p3), 60416  }
   0xb   : > { %650 = vmatprep.subr.bf16.mxu1 (!%p218_p3), %v748_v0  ;;  %652 = vmatprep.mubr.msk.bf16.mxu1 (!%p218_p3), %vm749_vm1, %v748_v0  ;;  %325 = vst.msk [vmem:[#allocation2] sm:$0xff] (!%p218_p3), %vm324_vm2, %v750_v4  ;;  %326 = vst.msk [vmem:[#allocation3] sm:$0xff] (!%p218_p3), %vm324_vm2, %v748_v0 }
   0xc   : > { %700 = vset.pattern.permute.xlu0 (!%p218_p3), %v751_v10  ;;  %701 = vset.pattern.permute.xlu1 (!%p218_p3), %v751_v10 }
  0x10   : > { %s861_s13 = smov (!%p275_p5, %s734_s13), 1  ;;  %s863_s12 = smov (!%p277_p6, %s730_s12), 3 }
  0x11   : > { %s628_s19 = sshll.u32 %s861_s13, 2  ;;  %v403_v31 = vld [vmem:[#allocation4] sm:$0xff] }
  0x12   : > { %s283_s20 = sadd.s32 %s628_s19, %s863_s12  ;;  %v379_v11 = vld [vmem:[#allocation2] sm:$0xff]  ;;  %v395_v25 = vld [vmem:[#allocation3] sm:$0xff] }
  0x13   : > { %s803_s21 = sshll.u32 %s283_s20, 2 }
  0x14   : > { %s296_s24 = scalar_lea.vmem %s847_s1, %s803_s21  ;;  %s285_s27 = scalar_lea.vmem %s846_s0, %s803_s21 }
  0x15   : > { %v330_v1 = vld [vmem:[%s296_s24] sm:$0xf]  ;;  %s307_s30 = scalar_lea.vmem %s848_s2, %s803_s21  ;;  %s318_s6 = scalar_lea.vmem %s849_s3, %s803_s21 }
  0x16   : > { %v337_v2 = vsel %vm327_vm0, %v330_v1, 0  ;;  %v329_v3 = vld [vmem:[%s285_s27] sm:$0xf] }
  0x17   : > { %645 = vmatpush3.bf16.xpose.msra.mxu0 %v337_v2  ;;  %v331_v15 = vld [vmem:[%s307_s30] sm:$0xf] }
  0x18   : > { %v416_v16 = vsel %vm414_vm3, %v331_v15, 0 }
  0x19   : > { %651 = vmatpush3.bf16.msra.mxu1 %v416_v16 }
  0x1e   : > { %647 = vmatmul.mubr.msk.bf16.vlgmr.msra.gmra.mrb[0].mxu0 %vm327_vm0, %v329_v3 }
  0xf1   : > { %v373_v5 = vpop.f32.mrb[0].mxu0 }
  0xf2   : > { %v648_v6 = vpop.f32.mrb[1].mxu0  ;;  %v380_v7 = vsel %vm327_vm0, %v373_v5, -inf }
  0xf3   : > { %381 = vmax.xlane.f32.xlu0 %v380_v7  ;;  %v376_v8 = vpop.f32.mrb[2].mxu0 }
  0xf4   : > { %v649_v9 = vpop.f32.mrb[3].mxu0 }
 0x180   : > { %v382_v12 = vpop.xlane.xlu0 %381 }
 0x181   : > { %v383_v13 = vmax.f32 %v379_v11, %v382_v12 }
 0x183   : > { %v384_v14 = vsub.f32 %v379_v11, %v383_v13  ;;  %460 = vst.msk [vmem:[#allocation2] sm:$0xff] %vm324_vm2, %v383_v13  ;;  %389 = vperm.xlu0 %700, %v383_v13  }
 0x185   : > { %v385_v23 = vmul.f32 1.442695, %v384_v14 }
 0x202   : > { %v390_v17 = vpop.permute.xlu0 %389 }
 0x203   : > { %v392_v18 = vsub.f32 %v373_v5, %v390_v17 }
 0x205   : > { %v393_v19 = vmul.f32 1.442695, %v392_v18 }
 0x207   : > { %702 = vpow2.f32 %v393_v19 }
 0x208   : > { %704 = vpow2.f32 %v385_v23 }
 0x211   : > { %v703_v20 = vpop.eup %702 }
 0x212   : > { %v397_v21 = vsel %vm327_vm0, %v703_v20, 0.0  ;;  %v410_v22 = vpack.c.bf16 %v703_v20, %v703_v20  ;;  %v705_v24 = vpop.eup %704 }
 0x213   : > { %398 = vadd.xlane.f32.xlu1 %v397_v21  ;;  %v396_v26 = vmul.f32 %v705_v24, %v395_v25 }
 0x214   : > { %653 = vmatmul.mubr.msk.bf16.vlgmr.msra.gmra.mrb[0].mxu1 %vm327_vm0, %v410_v22 }
 0x224   : > { %406 = vperm.xlu1 %701, %v705_v24  }
 0x2a0   : > { %v399_v27 = vpop.xlane.xlu1 %398 }
 0x2a1   : > { %v400_v28 = vadd.f32 %v399_v27, %v396_v26 }
 0x2a3   : > { %402 = vst.msk [vmem:[#allocation3] sm:$0xff] %vm324_vm2, %v400_v28 }
 0x2a4   : > { %v407_v32 = vpop.permute.xlu1 %406 }
 0x2a5   : > { %v409_v33 = vmul.f32 %v407_v32, %v403_v31 }
 0x2aa   : > { %v464_v29 = vld [vmem:[#allocation3] sm:$0xff] }
 0x2ab   : > { %706 = vrcp.f32 %v464_v29 }
 0x2b5   : > { %v707_v30 = vpop.eup %706 }
 0x2b6   : > { %469 = vperm.xlu1 %701, %v707_v30  }
 0x2e7   : > { %v452_v34 = vpop.f32.mrb[0].mxu1 }
 0x2e8   : > { %v458_v35 = vadd.f32 %v452_v34, %v409_v33  ;;  %v654_v36 = vpop.f32.mrb[1].mxu1 }
 0x2e9   : > { %v455_v37 = vpop.f32.mrb[2].mxu1 }
 0x2ea   : > { %459 = vst.msk [vmem:[#allocation4] sm:$0xff] %vm327_vm0, %v458_v35  ;;  %v655_v38 = vpop.f32.mrb[3].mxu1 }
 0x2f1   : > { %v466_v39 = vld [vmem:[#allocation4] sm:$0xff] }
 0x335   : > { %v470_v40 = vpop.permute.xlu1 %469 }
 0x336   : > { %v472_v41 = vmul.f32 %v470_v40, %v466_v39 }
 0x338   : > { %v473_v42 = vpack.c.bf16 %v472_v41, %v472_v41 }
 0x33a   : > { %475 = vst.msk [vmem:[%s318_s6] sm:$0xf] %vm474_vm4, %v473_v42 }
 0x33b PF: > { %s13_s16 = sadd.s32 1, %s746_s16   ;;  %s850_s12 = smov %s738_s14 }
 0x33c   : > { %p10_p7 = scmp.ge.s32.totalorder %s13_s16, 10   ;;  %s851_s13 = smov %s742_s15 }
 0x33d   : > { %s852_s14 = smov %s855_s17  ;;  %s853_s15 = smov %s859_s18 }
 0x33e   :  { %12 = sbr.rel (!%p10_p7) target bundleno = 3 (0x3), region = 76 }

// kernel: decoder_block_forward.26
= control target key start
LH: loop header
LB: loop body
LE: loop exit
PB: predicated region body
PF: predicated region fallthrough
CT: control target
= control target key end

     0   :  { %v227_v0 = vmov 0.0   ;;  %vm228_vm0 = vmmov 0   ;;  %v147_v10 = vlaneseq  ;;  %s282_s1 = inlined_call_operand.vmem [shape: bf16[128,128], index: 1, kind: input, shape index: {}]   ;;  %s283_s0 = inlined_call_operand.vmem [shape: bf16[16,128], index: 0, kind: input, shape index: {}]   ;;  %s284_s2 = inlined_call_operand.vmem [shape: bf16[1,128], index: 2, kind: input, shape index: {}]   ;;  %s285_s3 = inlined_call_operand.vmem [shape: bf16[16,128], index: 3, kind: output, shape index: {}]  }
   0x1   :  { %196 = vmatprep.subr.bf16.mxu0 %v227_v0  ;;  %v218_v1 = vld [vmem:[%s282_s1] sm:$0xff]   ;;  %212 = vmatprep.mubr.msk.bf16.mxu0 %vm228_vm0, %v227_v0  ;;  %v219_v2 = vld [vmem:[%s282_s1 + $0x8] sm:$0xff]   ;;  %v220_v3 = vld [vmem:[%s282_s1 + $0x10] sm:$0xff]  }
   0x2   :  { %197 = vmatpush3.bf16.msra.mxu0 %v218_v1  ;;  %v221_v4 = vld [vmem:[%s282_s1 + $0x18] sm:$0xff]   ;;  %v222_v5 = vld [vmem:[%s282_s1 + $0x20] sm:$0xff]   ;;  %v223_v6 = vld [vmem:[%s282_s1 + $0x28] sm:$0xff]   ;;  %v148_v11 = vshrl.u32 %v147_v10, 7 }
   0x3   :  { %198 = vmatprep.subr.bf16.mxu0 %v227_v0  ;;  %v224_v7 = vld [vmem:[%s282_s1 + $0x30] sm:$0xff]   ;;  %v225_v8 = vld [vmem:[%s282_s1 + $0x38] sm:$0xff]   ;;  %v226_v9 = vld [vmem:[%s283_s0] sm:$0xff]  }
   0x4   :  { %v145_v12 = vld [vmem:[%s284_s2] sm:$0x1]  ;;  %v149_v14 = vsub.s32 0, %v148_v11 }
   0x5   :  { %v146_v13 = vunpack.c.l.bf16 %v145_v12 }
   0x6   :  { %199 = vmatpush3.bf16.msra.mxu0 %v219_v2 }
   0x7   :  { %200 = vmatprep.subr.bf16.mxu0 %v227_v0  ;;  %v150_v15 = vrot.slane %v146_v13, %v149_v14 }
   0xa   :  { %201 = vmatpush3.bf16.msra.mxu0 %v220_v3 }
   0xb   :  { %202 = vmatprep.subr.bf16.mxu0 %v227_v0 }
   0xe   :  { %203 = vmatpush3.bf16.msra.mxu0 %v221_v4 }
   0xf   :  { %204 = vmatprep.subr.bf16.mxu0 %v227_v0 }
  0x12   :  { %205 = vmatpush3.bf16.msra.mxu0 %v222_v5 }
  0x13   :  { %206 = vmatprep.subr.bf16.mxu0 %v227_v0 }
  0x16   :  { %207 = vmatpush3.bf16.msra.mxu0 %v223_v6 }
  0x17   :  { %208 = vmatprep.subr.bf16.mxu0 %v227_v0 }
  0x1a   :  { %209 = vmatpush3.bf16.msra.mxu0 %v224_v7 }
  0x1b   :  { %210 = vmatprep.subr.bf16.mxu0 %v227_v0 }
  0x1e   :  { %211 = vmatpush3.bf16.msra.mxu0 %v225_v8 }
  0x21   :  { %213 = vmatmul.mubr.bf16.vlgmr.msra.gmra.mrb[0].mxu0 %v226_v9 }
  0xf4   :  { %v129_v16 = vpop.f32.mrb[0].mxu0 }
  0xf5   :  { %v151_v17 = vadd.f32 %v150_v15, %v129_v16  ;;  %v214_v18 = vpop.f32.mrb[1].mxu0 }
  0xf6   :  { %v132_v19 = vpop.f32.mrb[2].mxu0 }
  0xf7   :  { %v152_v20 = vadd.f32 %v150_v15, %v132_v19  ;;  %v215_v21 = vpop.f32.mrb[3].mxu0  ;;  %v153_v22 = vmax.f32 %v151_v17, 0.0 }
  0xf9   :  { %v154_v23 = vmax.f32 %v152_v20, 0.0 }
  0xfb   :  { %v185_v24 = vpack.c.bf16 %v154_v23, %v153_v22 }
  0xfd   :  { %186 = vst [vmem:[%s285_s3] sm:$0xff] %v185_v24  }

</bundles_post_ra>
